<compile_context>
chip_gen: v7x
topology: tpu7x:2x2x1
jax: 0.10.0
libtpu: 0.0.40
codegen_flags: <defaults>
</compile_context>

<pallas_src>
import functools
import numpy as np

import jax
import jax.numpy as jnp
from jax.experimental import pallas as pl
from jax.experimental.pallas import tpu as pltpu


# ----------------------------------------------------------------------------
# Pallas kernel: entire forward pass for one batch tile.
# Layout: (batch, features) row-major, features on lanes, batch on sublanes.
# Linear weights are (in_features, out_features), bf16; activations f32.
# ----------------------------------------------------------------------------
def cvae_iaf_kernel(
    xc_ref, c_ref, eps_ref, keep_q_ref, keep_p_ref,          # activations / RNG
    ew1_ref, eb1_ref, ew2_ref, eb2_ref, whead_ref, bhead_ref,  # encoder
    iaf_win_ref, iaf_bin_ref, iaf_wh_ref, iaf_bh_ref,
    iaf_wms_ref, iaf_bms_ref,                                  # IAF (stacked)
    dw1z_ref, dw1c_ref, db1_ref, dw2_ref, db2_ref, dw3_ref, db3_ref,  # decoder
    recon_ref, loss_ref,                                       # outputs
):
    f32 = jnp.float32
    bf16 = jnp.bfloat16

    xc = xc_ref[...]
    c = c_ref[...]
    x_dim = recon_ref.shape[1]
    z_dim = eps_ref.shape[1]
    x = xc[:, :x_dim]

    def mm(a, w, b=None):
        # bf16 x bf16 -> f32 accumulation on the MXU.
        y = jnp.dot(a.astype(bf16), w, preferred_element_type=f32)
        if b is not None:
            y = y + b
        return y

    def log_sigmoid(s):
        # numerically stable: log(sigmoid(s)) = min(s,0) - log(1 + exp(-|s|))
        return jnp.minimum(s, 0.0) - jnp.log(1.0 + jnp.exp(-jnp.abs(s)))

    # ---------------- Encoder ----------------
    h = jnp.maximum(mm(xc, ew1_ref[...], eb1_ref[...]), 0.0)
    h = h * (2.0 * keep_q_ref[...])              # Dropout(0.5), training mode
    h = jnp.maximum(mm(h, ew2_ref[...], eb2_ref[...]), 0.0)
    head = mm(h, whead_ref[...], bhead_ref[...])  # packed [mu | logvar]
    z_mu = head[:, :z_dim]
    z_logvar = head[:, z_dim:]

    # ---------------- Reparameterization ----------------
    eps = eps_ref[...]
    z0 = z_mu + jnp.exp(0.5 * z_logvar) * eps

    # ---------------- IAF flow (parallel "inverse" MADE pass) ----------------
    n_blocks = iaf_win_ref.shape[0]
    n_hid_minus1 = iaf_wh_ref.shape[1]
    z = z0
    lad = jnp.zeros((z.shape[0], 1), dtype=f32)   # log|det dz_k/dz_0|
    for blk in range(n_blocks):
        hh = jnp.maximum(mm(z, iaf_win_ref[blk], iaf_bin_ref[blk]), 0.0)
        for l in range(n_hid_minus1):
            hh = jnp.maximum(mm(hh, iaf_wh_ref[blk, l], iaf_bh_ref[blk, l]), 0.0)
        ms = mm(hh, iaf_wms_ref[blk], iaf_bms_ref[blk])   # packed [m | s]
        m = ms[:, :z_dim]
        s = ms[:, z_dim:]
        log_sigma = log_sigmoid(s)
        sigma = jnp.exp(log_sigma)
        z = sigma * z + (1.0 - sigma) * m
        lad = lad + jnp.sum(log_sigma, axis=1, keepdims=True)
    zk = z

    # ---------------- Decoder ----------------
    # c-term is independent of zk -> not on the serial chain; keep split dots.
    hd = jnp.maximum(
        mm(zk, dw1z_ref[...]) + mm(c, dw1c_ref[...]) + db1_ref[...], 0.0)
    hd = hd * (2.0 * keep_p_ref[...])            # Dropout(0.5), training mode
    hd = jnp.maximum(mm(hd, dw2_ref[...], db2_ref[...]), 0.0)
    recon = mm(hd, dw3_ref[...], db3_ref[...])
    recon_ref[...] = recon

    # ---------------- Per-sample loss ----------------
    recon_loss = 0.5 * jnp.sum((recon - x) ** 2, axis=1, keepdims=True)
    # (z0 - mu)^2 * exp(-logvar) == eps^2 exactly.
    log_prob_z0 = -0.5 * jnp.sum(z_logvar + eps * eps, axis=1, keepdims=True)
    log_prob_zk = -0.5 * jnp.sum(zk * zk, axis=1, keepdims=True)
    kld = log_prob_z0 - log_prob_zk - lad
    loss_ref[...] = recon_loss + kld


# ----------------------------------------------------------------------------
# Wrapper
# ----------------------------------------------------------------------------
def _cost_estimate(batch, z_dim, params, act_arrays, out_bytes):
    flops = 0
    for p in params:
        if p.ndim == 2 and p.shape[0] > 1:                  # 2-D weight
            flops += 2 * batch * p.shape[0] * p.shape[1]
        elif p.ndim == 3 and p.shape[1] > 1:                # stacked (nb,K,N)
            flops += 2 * batch * p.shape[0] * p.shape[1] * p.shape[2]
        elif p.ndim == 4 and p.shape[2] > 1:                # stacked (nb,L,K,N)
            flops += 2 * batch * int(np.prod(p.shape))
    nb = params[6].shape[0]
    transcendentals = batch * z_dim * (1 + 3 * nb)
    bytes_accessed = out_bytes
    for a in list(params) + list(act_arrays):
        bytes_accessed += a.size * a.dtype.itemsize
    return pl.CostEstimate(flops=int(flops),
                           transcendentals=int(transcendentals),
                           bytes_accessed=int(bytes_accessed))


@functools.partial(jax.jit, static_argnames=("tile_b",))
def cvae_iaf_forward(x, c, eps, keep_q, keep_p, params, tile_b=None):
    B, x_dim = x.shape
    c_dim = c.shape[1]
    z_dim = eps.shape[1]
    hQ = keep_q.shape[1]
    hP = keep_p.shape[1]
    if tile_b is None:
        tile_b = min(B, 128)
    assert B % tile_b == 0, "batch must be a multiple of tile_b"

    xc = jnp.concatenate([x, c], axis=1)   # fuse [x|c] once, outside the kernel
    grid = (B // tile_b,)

    def act_spec(ncols):
        return pl.BlockSpec((tile_b, ncols), lambda i: (i, 0))

    w_spec = pl.BlockSpec(memory_space=pltpu.MemorySpace.VMEM)  # whole array

    in_specs = ([act_spec(x_dim + c_dim), act_spec(c_dim), act_spec(z_dim),
                 act_spec(hQ), act_spec(hP)]
                + [w_spec] * len(params))
    out_specs = (pl.BlockSpec((tile_b, x_dim), lambda i: (i, 0)),
                 pl.BlockSpec((tile_b, 1), lambda i: (i, 0)))
    out_shape = (jax.ShapeDtypeStruct((B, x_dim), jnp.float32),
                 jax.ShapeDtypeStruct((B, 1), jnp.float32))

    out_bytes = B * x_dim * 4 + B * 4
    ce = _cost_estimate(B, z_dim, params, (xc, c, eps, keep_q, keep_p), out_bytes)

    recon_x, per_sample_loss = pl.pallas_call(
        cvae_iaf_kernel,
        grid=grid,
        out_shape=out_shape,
        in_specs=in_specs,
        out_specs=out_specs,
        compiler_params=pltpu.CompilerParams(
            dimension_semantics=("parallel",)),
        cost_estimate=ce,
    )(xc, c, eps, keep_q, keep_p, *params)

    loss = jnp.mean(per_sample_loss)       # (recon_loss + KLD).mean(dim=0)
    return recon_x, loss


# ----------------------------------------------------------------------------
# Deterministic parameter construction (shapes follow the module __init__)
# ----------------------------------------------------------------------------
def made_masks(z_dim, hidden, n_hidden):
    in_deg = np.arange(z_dim)
    hid_degs = [np.arange(hidden) % max(z_dim - 1, 1) for _ in range(n_hidden)]
    out_deg = np.arange(z_dim)
    mask_in = (hid_degs[0][None, :] >= in_deg[:, None]).astype(np.float32)
    mask_hid = [(hid_degs[l + 1][None, :] >= hid_degs[l][:, None]).astype(np.float32)
                for l in range(n_hidden - 1)]
    mask_out = (out_deg[None, :] > hid_degs[-1][:, None]).astype(np.float32)
    return mask_in, mask_hid, mask_out


def init_params(key, cfg, weight_dtype=jnp.bfloat16):
    x_dim, c_dim, z_dim = cfg["x_dim"], cfg["c_dim"], cfg["z_dim"]
    hQ, hP = cfg["h_Q_dim"], cfg["h_P_dim"]
    nb, nh, hid = cfg["n_made_blocks"], cfg["n_hidden_in_made"], cfg["hidden_size"]
    assert nh >= 2, "n_hidden_in_made >= 2 expected"

    keys = iter(jax.random.split(key, 256))

    def w(fan_in, shape):
        return (jax.random.normal(next(keys), shape, dtype=jnp.float32)
                / np.sqrt(float(fan_in)))

    def b(shape):
        return 0.01 * jax.random.normal(next(keys), shape, dtype=jnp.float32)

    # Encoder (weights bf16, biases f32)
    ew1 = w(x_dim + c_dim, (x_dim + c_dim, hQ)).astype(weight_dtype)
    eb1 = b((1, hQ))
    ew2 = w(hQ, (hQ, hQ)).astype(weight_dtype)
    eb2 = b((1, hQ))
    wmu, bmu = w(hQ, (hQ, z_dim)), b((1, z_dim))
    wlv, blv = w(hQ, (hQ, z_dim)), b((1, z_dim))
    whead = jnp.concatenate([wmu, wlv], axis=1).astype(weight_dtype)  # [mu|logvar]
    bhead = jnp.concatenate([bmu, blv], axis=1)

    # IAF: MADE masks baked into weights; m/s heads packed per block.
    mask_in, mask_hid, mask_out = made_masks(z_dim, hid, nh)
    mask_in = jnp.asarray(mask_in)
    mask_hid = [jnp.asarray(m) for m in mask_hid]
    mask_out = jnp.asarray(mask_out)

    win, bin_, wh, bh, wms, bms = [], [], [], [], [], []
    for _ in range(nb):
        win.append(w(z_dim, (z_dim, hid)) * mask_in)
        bin_.append(b((1, hid)))
        wh.append(jnp.stack([w(hid, (hid, hid)) * mask_hid[l] for l in range(nh - 1)]))
        bh.append(jnp.stack([b((1, hid)) for _ in range(nh - 1)]))
        wm = w(hid, (hid, z_dim)) * mask_out
        ws_ = w(hid, (hid, z_dim)) * mask_out
        wms.append(jnp.concatenate([wm, ws_], axis=1))                 # [m|s]
        bms.append(jnp.concatenate([b((1, z_dim)),
                                    b((1, z_dim)) + 1.0], axis=1))     # bias s -> ~0.73
    iaf_win = jnp.stack(win).astype(weight_dtype)
    iaf_bin = jnp.stack(bin_)
    iaf_wh = jnp.stack(wh).astype(weight_dtype)
    iaf_bh = jnp.stack(bh)
    iaf_wms = jnp.stack(wms).astype(weight_dtype)
    iaf_bms = jnp.stack(bms)

    # Decoder
    dw1 = w(z_dim + c_dim, (z_dim + c_dim, hP))
    dw1z = dw1[:z_dim].astype(weight_dtype)
    dw1c = dw1[z_dim:].astype(weight_dtype)
    db1 = b((1, hP))
    dw2 = w(hP, (hP, hP)).astype(weight_dtype)
    db2 = b((1, hP))
    dw3 = w(hP, (hP, x_dim)).astype(weight_dtype)
    db3 = b((1, x_dim))

    return (ew1, eb1, ew2, eb2, whead, bhead,
            iaf_win, iaf_bin, iaf_wh, iaf_bh, iaf_wms, iaf_bms,
            dw1z, dw1c, db1, dw2, db2, dw3, db3)


if __name__ == "__main__":
    B = 16
    cfg = dict(x_dim=64, c_dim=8, z_dim=32, h_Q_dim=128, h_P_dim=128,
               n_made_blocks=2, n_hidden_in_made=2, hidden_size=64)

    key = jax.random.PRNGKey(0)
    kparam, kx, kc, ke, kdq, kdp = jax.random.split(key, 6)
    params = init_params(kparam, cfg)

    x = jax.random.normal(kx, (B, cfg["x_dim"]), dtype=jnp.float32)
    c = jax.random.normal(kc, (B, cfg["c_dim"]), dtype=jnp.float32)
    eps = jax.random.normal(ke, (B, cfg["z_dim"]), dtype=jnp.float32)
    # Dropout(0.5) keep masks, training mode (drawn host-side; vary the key per step).
    keep_q = jax.random.bernoulli(kdq, 0.5, (B, cfg["h_Q_dim"])).astype(jnp.float32)
    keep_p = jax.random.bernoulli(kdp, 0.5, (B, cfg["h_P_dim"])).astype(jnp.float32)

    recon_x, loss = cvae_iaf_forward(x, c, eps, keep_q, keep_p, params, tile_b=8)
    jax.block_until_ready((recon_x, loss))

    assert recon_x.shape == (B, cfg["x_dim"])
    assert bool(jnp.isfinite(loss))
    print("KERNEL_OK")
</pallas_src>

<mosaic_0001>
module attributes {stable_mosaic.version = 11 : i64} {
  func.func @cvae_iaf_kernel(%arg0: i32, %arg1: memref<8x72xf32, #tpu.memory_space<vmem>>, %arg2: memref<8x8xf32, #tpu.memory_space<vmem>>, %arg3: memref<8x32xf32, #tpu.memory_space<vmem>>, %arg4: memref<8x128xf32, #tpu.memory_space<vmem>>, %arg5: memref<8x128xf32, #tpu.memory_space<vmem>>, %arg6: memref<72x128xbf16, #tpu.memory_space<vmem>>, %arg7: memref<1x128xf32, #tpu.memory_space<vmem>>, %arg8: memref<128x128xbf16, #tpu.memory_space<vmem>>, %arg9: memref<1x128xf32, #tpu.memory_space<vmem>>, %arg10: memref<128x64xbf16, #tpu.memory_space<vmem>>, %arg11: memref<1x64xf32, #tpu.memory_space<vmem>>, %arg12: memref<2x32x64xbf16, #tpu.memory_space<vmem>>, %arg13: memref<2x1x64xf32, #tpu.memory_space<vmem>>, %arg14: memref<2x1x64x64xbf16, #tpu.memory_space<vmem>>, %arg15: memref<2x1x1x64xf32, #tpu.memory_space<vmem>>, %arg16: memref<2x64x64xbf16, #tpu.memory_space<vmem>>, %arg17: memref<2x1x64xf32, #tpu.memory_space<vmem>>, %arg18: memref<32x128xbf16, #tpu.memory_space<vmem>>, %arg19: memref<8x128xbf16, #tpu.memory_space<vmem>>, %arg20: memref<1x128xf32, #tpu.memory_space<vmem>>, %arg21: memref<128x128xbf16, #tpu.memory_space<vmem>>, %arg22: memref<1x128xf32, #tpu.memory_space<vmem>>, %arg23: memref<128x64xbf16, #tpu.memory_space<vmem>>, %arg24: memref<1x64xf32, #tpu.memory_space<vmem>>, %arg25: memref<8x64xf32, #tpu.memory_space<vmem>>, %arg26: memref<8x1xf32, #tpu.memory_space<vmem>>) attributes {dimension_semantics = [#tpu.dimension_semantics<parallel>], iteration_bounds = array<i64: 2>, scalar_prefetch = 0 : i64, scratch_operands = 0 : i64, tpu.core_type = #tpu.core_type<tc>, window_params = [{transform_indices = @transform_0, window_bounds = array<i64: 8, 72>}, {transform_indices = @transform_1, window_bounds = array<i64: 8, 8>}, {transform_indices = @transform_2, window_bounds = array<i64: 8, 32>}, {transform_indices = @transform_3, window_bounds = array<i64: 8, 128>}, {transform_indices = @transform_4, window_bounds = array<i64: 8, 128>}, {pipeline_mode = #tpu.pipeline_mode<synchronous>, transform_indices = @transform_5, window_bounds = array<i64: 72, 128>}, {pipeline_mode = #tpu.pipeline_mode<synchronous>, transform_indices = @transform_6, window_bounds = array<i64: 1, 128>}, {pipeline_mode = #tpu.pipeline_mode<synchronous>, transform_indices = @transform_7, window_bounds = array<i64: 128, 128>}, {pipeline_mode = #tpu.pipeline_mode<synchronous>, transform_indices = @transform_8, window_bounds = array<i64: 1, 128>}, {pipeline_mode = #tpu.pipeline_mode<synchronous>, transform_indices = @transform_9, window_bounds = array<i64: 128, 64>}, {pipeline_mode = #tpu.pipeline_mode<synchronous>, transform_indices = @transform_10, window_bounds = array<i64: 1, 64>}, {pipeline_mode = #tpu.pipeline_mode<synchronous>, transform_indices = @transform_11, window_bounds = array<i64: 2, 32, 64>}, {pipeline_mode = #tpu.pipeline_mode<synchronous>, transform_indices = @transform_12, window_bounds = array<i64: 2, 1, 64>}, {pipeline_mode = #tpu.pipeline_mode<synchronous>, transform_indices = @transform_13, window_bounds = array<i64: 2, 1, 64, 64>}, {pipeline_mode = #tpu.pipeline_mode<synchronous>, transform_indices = @transform_14, window_bounds = array<i64: 2, 1, 1, 64>}, {pipeline_mode = #tpu.pipeline_mode<synchronous>, transform_indices = @transform_15, window_bounds = array<i64: 2, 64, 64>}, {pipeline_mode = #tpu.pipeline_mode<synchronous>, transform_indices = @transform_16, window_bounds = array<i64: 2, 1, 64>}, {pipeline_mode = #tpu.pipeline_mode<synchronous>, transform_indices = @transform_17, window_bounds = array<i64: 32, 128>}, {pipeline_mode = #tpu.pipeline_mode<synchronous>, transform_indices = @transform_18, window_bounds = array<i64: 8, 128>}, {pipeline_mode = #tpu.pipeline_mode<synchronous>, transform_indices = @transform_19, window_bounds = array<i64: 1, 128>}, {pipeline_mode = #tpu.pipeline_mode<synchronous>, transform_indices = @transform_20, window_bounds = array<i64: 128, 128>}, {pipeline_mode = #tpu.pipeline_mode<synchronous>, transform_indices = @transform_21, window_bounds = array<i64: 1, 128>}, {pipeline_mode = #tpu.pipeline_mode<synchronous>, transform_indices = @transform_22, window_bounds = array<i64: 128, 64>}, {pipeline_mode = #tpu.pipeline_mode<synchronous>, transform_indices = @transform_23, window_bounds = array<i64: 1, 64>}, {transform_indices = @transform_24, window_bounds = array<i64: 8, 64>}, {transform_indices = @transform_25, window_bounds = array<i64: 8, 1>}]} {
    %c0 = arith.constant 0 : index
    %c0_0 = arith.constant 0 : index
    %0 = vector.load %arg1[%c0, %c0_0] : memref<8x72xf32, #tpu.memory_space<vmem>>, vector<8x72xf32>
    %c0_1 = arith.constant 0 : index
    %c0_2 = arith.constant 0 : index
    %1 = vector.load %arg2[%c0_1, %c0_2] : memref<8x8xf32, #tpu.memory_space<vmem>>, vector<8x8xf32>
    %2 = vector.extract_strided_slice %0 {offsets = [0, 0], sizes = [8, 64], strides = [1, 1]} : vector<8x72xf32> to vector<8x64xf32>
    %c0_3 = arith.constant 0 : index
    %c0_4 = arith.constant 0 : index
    %3 = vector.load %arg6[%c0_3, %c0_4] : memref<72x128xbf16, #tpu.memory_space<vmem>>, vector<72x128xbf16>
    %c0_5 = arith.constant 0 : index
    %c0_6 = arith.constant 0 : index
    %4 = vector.load %arg7[%c0_5, %c0_6] : memref<1x128xf32, #tpu.memory_space<vmem>>, vector<1x128xf32>
    %5 = arith.truncf %0 : vector<8x72xf32> to vector<8x72xbf16>
    %cst = arith.constant dense<0.000000e+00> : vector<8x128xf32>
    %6 = tpu.matmul %5, %3, %cst {dimension_numbers = #tpu.dot_dimension_numbers<[1], [0], [0], [1], [0, 0, 1, 1], [], []>} : vector<8x72xbf16>, vector<72x128xbf16>, vector<8x128xf32> -> vector<8x128xf32>
    %7 = vector.broadcast %4 : vector<1x128xf32> to vector<8x128xf32>
    %8 = arith.addf %6, %7 : vector<8x128xf32>
    %cst_7 = arith.constant 0.000000e+00 : f32
    %9 = vector.broadcast %cst_7 : f32 to vector<8x128xf32>
    %10 = arith.maximumf %8, %9 : vector<8x128xf32>
    %c0_8 = arith.constant 0 : index
    %c0_9 = arith.constant 0 : index
    %11 = vector.load %arg4[%c0_8, %c0_9] : memref<8x128xf32, #tpu.memory_space<vmem>>, vector<8x128xf32>
    %cst_10 = arith.constant 2.000000e+00 : f32
    %12 = vector.broadcast %cst_10 : f32 to vector<8x128xf32>
    %13 = arith.mulf %12, %11 : vector<8x128xf32>
    %14 = arith.mulf %10, %13 : vector<8x128xf32>
    %c0_11 = arith.constant 0 : index
    %c0_12 = arith.constant 0 : index
    %15 = vector.load %arg8[%c0_11, %c0_12] : memref<128x128xbf16, #tpu.memory_space<vmem>>, vector<128x128xbf16>
    %c0_13 = arith.constant 0 : index
    %c0_14 = arith.constant 0 : index
    %16 = vector.load %arg9[%c0_13, %c0_14] : memref<1x128xf32, #tpu.memory_space<vmem>>, vector<1x128xf32>
    %17 = arith.truncf %14 : vector<8x128xf32> to vector<8x128xbf16>
    %cst_15 = arith.constant dense<0.000000e+00> : vector<8x128xf32>
    %18 = tpu.matmul %17, %15, %cst_15 {dimension_numbers = #tpu.dot_dimension_numbers<[1], [0], [0], [1], [0, 0, 1, 1], [], []>} : vector<8x128xbf16>, vector<128x128xbf16>, vector<8x128xf32> -> vector<8x128xf32>
    %19 = vector.broadcast %16 : vector<1x128xf32> to vector<8x128xf32>
    %20 = arith.addf %18, %19 : vector<8x128xf32>
    %cst_16 = arith.constant 0.000000e+00 : f32
    %21 = vector.broadcast %cst_16 : f32 to vector<8x128xf32>
    %22 = arith.maximumf %20, %21 : vector<8x128xf32>
    %c0_17 = arith.constant 0 : index
    %c0_18 = arith.constant 0 : index
    %23 = vector.load %arg10[%c0_17, %c0_18] : memref<128x64xbf16, #tpu.memory_space<vmem>>, vector<128x64xbf16>
    %c0_19 = arith.constant 0 : index
    %c0_20 = arith.constant 0 : index
    %24 = vector.load %arg11[%c0_19, %c0_20] : memref<1x64xf32, #tpu.memory_space<vmem>>, vector<1x64xf32>
    %25 = arith.truncf %22 : vector<8x128xf32> to vector<8x128xbf16>
    %cst_21 = arith.constant dense<0.000000e+00> : vector<8x64xf32>
    %26 = tpu.matmul %25, %23, %cst_21 {dimension_numbers = #tpu.dot_dimension_numbers<[1], [0], [0], [1], [0, 0, 1, 1], [], []>} : vector<8x128xbf16>, vector<128x64xbf16>, vector<8x64xf32> -> vector<8x64xf32>
    %27 = vector.broadcast %24 : vector<1x64xf32> to vector<8x64xf32>
    %28 = arith.addf %26, %27 : vector<8x64xf32>
    %29 = vector.extract_strided_slice %28 {offsets = [0, 0], sizes = [8, 32], strides = [1, 1]} : vector<8x64xf32> to vector<8x32xf32>
    %30 = vector.extract_strided_slice %28 {offsets = [0, 32], sizes = [8, 32], strides = [1, 1]} : vector<8x64xf32> to vector<8x32xf32>
    %c0_22 = arith.constant 0 : index
    %c0_23 = arith.constant 0 : index
    %31 = vector.load %arg3[%c0_22, %c0_23] : memref<8x32xf32, #tpu.memory_space<vmem>>, vector<8x32xf32>
    %cst_24 = arith.constant 5.000000e-01 : f32
    %32 = vector.broadcast %cst_24 : f32 to vector<8x32xf32>
    %33 = arith.mulf %32, %30 : vector<8x32xf32>
    %34 = math.exp %33 : vector<8x32xf32>
    %35 = arith.mulf %34, %31 : vector<8x32xf32>
    %36 = arith.addf %29, %35 : vector<8x32xf32>
    %cst_25 = arith.constant 0.000000e+00 : f32
    %37 = vector.broadcast %cst_25 : f32 to vector<8x1xf32>
    %c0_26 = arith.constant 0 : index
    %c0_27 = arith.constant 0 : index
    %c0_28 = arith.constant 0 : index
    %38 = vector.load %arg12[%c0_26, %c0_27, %c0_28] : memref<2x32x64xbf16, #tpu.memory_space<vmem>>, vector<1x32x64xbf16>
    %39 = vector.shape_cast %38 : vector<1x32x64xbf16> to vector<32x64xbf16>
    %c0_29 = arith.constant 0 : index
    %c0_30 = arith.constant 0 : index
    %c0_31 = arith.constant 0 : index
    %40 = vector.load %arg13[%c0_29, %c0_30, %c0_31] : memref<2x1x64xf32, #tpu.memory_space<vmem>>, vector<1x1x64xf32>
    %41 = vector.shape_cast %40 : vector<1x1x64xf32> to vector<1x64xf32>
    %42 = arith.truncf %36 : vector<8x32xf32> to vector<8x32xbf16>
    %cst_32 = arith.constant dense<0.000000e+00> : vector<8x64xf32>
    %43 = tpu.matmul %42, %39, %cst_32 {dimension_numbers = #tpu.dot_dimension_numbers<[1], [0], [0], [1], [0, 0, 1, 1], [], []>} : vector<8x32xbf16>, vector<32x64xbf16>, vector<8x64xf32> -> vector<8x64xf32>
    %44 = vector.broadcast %41 : vector<1x64xf32> to vector<8x64xf32>
    %45 = arith.addf %43, %44 : vector<8x64xf32>
    %cst_33 = arith.constant 0.000000e+00 : f32
    %46 = vector.broadcast %cst_33 : f32 to vector<8x64xf32>
    %47 = arith.maximumf %45, %46 : vector<8x64xf32>
    %c0_34 = arith.constant 0 : index
    %c0_35 = arith.constant 0 : index
    %c0_36 = arith.constant 0 : index
    %c0_37 = arith.constant 0 : index
    %48 = vector.load %arg14[%c0_34, %c0_35, %c0_36, %c0_37] : memref<2x1x64x64xbf16, #tpu.memory_space<vmem>>, vector<1x1x64x64xbf16>
    %49 = vector.shape_cast %48 : vector<1x1x64x64xbf16> to vector<64x64xbf16>
    %c0_38 = arith.constant 0 : index
    %c0_39 = arith.constant 0 : index
    %c0_40 = arith.constant 0 : index
    %c0_41 = arith.constant 0 : index
    %50 = vector.load %arg15[%c0_38, %c0_39, %c0_40, %c0_41] : memref<2x1x1x64xf32, #tpu.memory_space<vmem>>, vector<1x1x1x64xf32>
    %51 = vector.shape_cast %50 : vector<1x1x1x64xf32> to vector<1x64xf32>
    %52 = arith.truncf %47 : vector<8x64xf32> to vector<8x64xbf16>
    %cst_42 = arith.constant dense<0.000000e+00> : vector<8x64xf32>
    %53 = tpu.matmul %52, %49, %cst_42 {dimension_numbers = #tpu.dot_dimension_numbers<[1], [0], [0], [1], [0, 0, 1, 1], [], []>} : vector<8x64xbf16>, vector<64x64xbf16>, vector<8x64xf32> -> vector<8x64xf32>
    %54 = vector.broadcast %51 : vector<1x64xf32> to vector<8x64xf32>
    %55 = arith.addf %53, %54 : vector<8x64xf32>
    %cst_43 = arith.constant 0.000000e+00 : f32
    %56 = vector.broadcast %cst_43 : f32 to vector<8x64xf32>
    %57 = arith.maximumf %55, %56 : vector<8x64xf32>
    %c0_44 = arith.constant 0 : index
    %c0_45 = arith.constant 0 : index
    %c0_46 = arith.constant 0 : index
    %58 = vector.load %arg16[%c0_44, %c0_45, %c0_46] : memref<2x64x64xbf16, #tpu.memory_space<vmem>>, vector<1x64x64xbf16>
    %59 = vector.shape_cast %58 : vector<1x64x64xbf16> to vector<64x64xbf16>
    %c0_47 = arith.constant 0 : index
    %c0_48 = arith.constant 0 : index
    %c0_49 = arith.constant 0 : index
    %60 = vector.load %arg17[%c0_47, %c0_48, %c0_49] : memref<2x1x64xf32, #tpu.memory_space<vmem>>, vector<1x1x64xf32>
    %61 = vector.shape_cast %60 : vector<1x1x64xf32> to vector<1x64xf32>
    %62 = arith.truncf %57 : vector<8x64xf32> to vector<8x64xbf16>
    %cst_50 = arith.constant dense<0.000000e+00> : vector<8x64xf32>
    %63 = tpu.matmul %62, %59, %cst_50 {dimension_numbers = #tpu.dot_dimension_numbers<[1], [0], [0], [1], [0, 0, 1, 1], [], []>} : vector<8x64xbf16>, vector<64x64xbf16>, vector<8x64xf32> -> vector<8x64xf32>
    %64 = vector.broadcast %61 : vector<1x64xf32> to vector<8x64xf32>
    %65 = arith.addf %63, %64 : vector<8x64xf32>
    %66 = vector.extract_strided_slice %65 {offsets = [0, 0], sizes = [8, 32], strides = [1, 1]} : vector<8x64xf32> to vector<8x32xf32>
    %67 = vector.extract_strided_slice %65 {offsets = [0, 32], sizes = [8, 32], strides = [1, 1]} : vector<8x64xf32> to vector<8x32xf32>
    %cst_51 = arith.constant 0.000000e+00 : f32
    %68 = vector.broadcast %cst_51 : f32 to vector<8x32xf32>
    %69 = arith.minimumf %67, %68 : vector<8x32xf32>
    %70 = math.absf %67 : vector<8x32xf32>
    %cst_52 = arith.constant 0.000000e+00 : f32
    %71 = vector.broadcast %cst_52 : f32 to vector<8x32xf32>
    %72 = arith.subf %71, %70 : vector<8x32xf32>
    %73 = math.exp %72 : vector<8x32xf32>
    %cst_53 = arith.constant 1.000000e+00 : f32
    %74 = vector.broadcast %cst_53 : f32 to vector<8x32xf32>
    %75 = arith.addf %74, %73 : vector<8x32xf32>
    %76 = math.log %75 : vector<8x32xf32>
    %77 = arith.subf %69, %76 : vector<8x32xf32>
    %78 = math.exp %77 : vector<8x32xf32>
    %79 = arith.mulf %78, %36 : vector<8x32xf32>
    %cst_54 = arith.constant 1.000000e+00 : f32
    %80 = vector.broadcast %cst_54 : f32 to vector<8x32xf32>
    %81 = arith.subf %80, %78 : vector<8x32xf32>
    %82 = arith.mulf %81, %66 : vector<8x32xf32>
    %83 = arith.addf %79, %82 : vector<8x32xf32>
    %cst_55 = arith.constant dense<0.000000e+00> : vector<8xf32>
    %84 = vector.multi_reduction <add>, %77, %cst_55 [1] : vector<8x32xf32> to vector<8xf32>
    %85 = vector.shape_cast %84 : vector<8xf32> to vector<8x1xf32>
    %86 = arith.addf %37, %85 : vector<8x1xf32>
    %c1 = arith.constant 1 : index
    %c0_56 = arith.constant 0 : index
    %c0_57 = arith.constant 0 : index
    %87 = vector.load %arg12[%c1, %c0_56, %c0_57] : memref<2x32x64xbf16, #tpu.memory_space<vmem>>, vector<1x32x64xbf16>
    %88 = vector.shape_cast %87 : vector<1x32x64xbf16> to vector<32x64xbf16>
    %c1_58 = arith.constant 1 : index
    %c0_59 = arith.constant 0 : index
    %c0_60 = arith.constant 0 : index
    %89 = vector.load %arg13[%c1_58, %c0_59, %c0_60] : memref<2x1x64xf32, #tpu.memory_space<vmem>>, vector<1x1x64xf32>
    %90 = vector.shape_cast %89 : vector<1x1x64xf32> to vector<1x64xf32>
    %91 = arith.truncf %83 : vector<8x32xf32> to vector<8x32xbf16>
    %cst_61 = arith.constant dense<0.000000e+00> : vector<8x64xf32>
    %92 = tpu.matmul %91, %88, %cst_61 {dimension_numbers = #tpu.dot_dimension_numbers<[1], [0], [0], [1], [0, 0, 1, 1], [], []>} : vector<8x32xbf16>, vector<32x64xbf16>, vector<8x64xf32> -> vector<8x64xf32>
    %93 = vector.broadcast %90 : vector<1x64xf32> to vector<8x64xf32>
    %94 = arith.addf %92, %93 : vector<8x64xf32>
    %cst_62 = arith.constant 0.000000e+00 : f32
    %95 = vector.broadcast %cst_62 : f32 to vector<8x64xf32>
    %96 = arith.maximumf %94, %95 : vector<8x64xf32>
    %c1_63 = arith.constant 1 : index
    %c0_64 = arith.constant 0 : index
    %c0_65 = arith.constant 0 : index
    %c0_66 = arith.constant 0 : index
    %97 = vector.load %arg14[%c1_63, %c0_64, %c0_65, %c0_66] : memref<2x1x64x64xbf16, #tpu.memory_space<vmem>>, vector<1x1x64x64xbf16>
    %98 = vector.shape_cast %97 : vector<1x1x64x64xbf16> to vector<64x64xbf16>
    %c1_67 = arith.constant 1 : index
    %c0_68 = arith.constant 0 : index
    %c0_69 = arith.constant 0 : index
    %c0_70 = arith.constant 0 : index
    %99 = vector.load %arg15[%c1_67, %c0_68, %c0_69, %c0_70] : memref<2x1x1x64xf32, #tpu.memory_space<vmem>>, vector<1x1x1x64xf32>
    %100 = vector.shape_cast %99 : vector<1x1x1x64xf32> to vector<1x64xf32>
    %101 = arith.truncf %96 : vector<8x64xf32> to vector<8x64xbf16>
    %cst_71 = arith.constant dense<0.000000e+00> : vector<8x64xf32>
    %102 = tpu.matmul %101, %98, %cst_71 {dimension_numbers = #tpu.dot_dimension_numbers<[1], [0], [0], [1], [0, 0, 1, 1], [], []>} : vector<8x64xbf16>, vector<64x64xbf16>, vector<8x64xf32> -> vector<8x64xf32>
    %103 = vector.broadcast %100 : vector<1x64xf32> to vector<8x64xf32>
    %104 = arith.addf %102, %103 : vector<8x64xf32>
    %cst_72 = arith.constant 0.000000e+00 : f32
    %105 = vector.broadcast %cst_72 : f32 to vector<8x64xf32>
    %106 = arith.maximumf %104, %105 : vector<8x64xf32>
    %c1_73 = arith.constant 1 : index
    %c0_74 = arith.constant 0 : index
    %c0_75 = arith.constant 0 : index
    %107 = vector.load %arg16[%c1_73, %c0_74, %c0_75] : memref<2x64x64xbf16, #tpu.memory_space<vmem>>, vector<1x64x64xbf16>
    %108 = vector.shape_cast %107 : vector<1x64x64xbf16> to vector<64x64xbf16>
    %c1_76 = arith.constant 1 : index
    %c0_77 = arith.constant 0 : index
    %c0_78 = arith.constant 0 : index
    %109 = vector.load %arg17[%c1_76, %c0_77, %c0_78] : memref<2x1x64xf32, #tpu.memory_space<vmem>>, vector<1x1x64xf32>
    %110 = vector.shape_cast %109 : vector<1x1x64xf32> to vector<1x64xf32>
    %111 = arith.truncf %106 : vector<8x64xf32> to vector<8x64xbf16>
    %cst_79 = arith.constant dense<0.000000e+00> : vector<8x64xf32>
    %112 = tpu.matmul %111, %108, %cst_79 {dimension_numbers = #tpu.dot_dimension_numbers<[1], [0], [0], [1], [0, 0, 1, 1], [], []>} : vector<8x64xbf16>, vector<64x64xbf16>, vector<8x64xf32> -> vector<8x64xf32>
    %113 = vector.broadcast %110 : vector<1x64xf32> to vector<8x64xf32>
    %114 = arith.addf %112, %113 : vector<8x64xf32>
    %115 = vector.extract_strided_slice %114 {offsets = [0, 0], sizes = [8, 32], strides = [1, 1]} : vector<8x64xf32> to vector<8x32xf32>
    %116 = vector.extract_strided_slice %114 {offsets = [0, 32], sizes = [8, 32], strides = [1, 1]} : vector<8x64xf32> to vector<8x32xf32>
    %cst_80 = arith.constant 0.000000e+00 : f32
    %117 = vector.broadcast %cst_80 : f32 to vector<8x32xf32>
    %118 = arith.minimumf %116, %117 : vector<8x32xf32>
    %119 = math.absf %116 : vector<8x32xf32>
    %cst_81 = arith.constant 0.000000e+00 : f32
    %120 = vector.broadcast %cst_81 : f32 to vector<8x32xf32>
    %121 = arith.subf %120, %119 : vector<8x32xf32>
    %122 = math.exp %121 : vector<8x32xf32>
    %cst_82 = arith.constant 1.000000e+00 : f32
    %123 = vector.broadcast %cst_82 : f32 to vector<8x32xf32>
    %124 = arith.addf %123, %122 : vector<8x32xf32>
    %125 = math.log %124 : vector<8x32xf32>
    %126 = arith.subf %118, %125 : vector<8x32xf32>
    %127 = math.exp %126 : vector<8x32xf32>
    %128 = arith.mulf %127, %83 : vector<8x32xf32>
    %cst_83 = arith.constant 1.000000e+00 : f32
    %129 = vector.broadcast %cst_83 : f32 to vector<8x32xf32>
    %130 = arith.subf %129, %127 : vector<8x32xf32>
    %131 = arith.mulf %130, %115 : vector<8x32xf32>
    %132 = arith.addf %128, %131 : vector<8x32xf32>
    %cst_84 = arith.constant dense<0.000000e+00> : vector<8xf32>
    %133 = vector.multi_reduction <add>, %126, %cst_84 [1] : vector<8x32xf32> to vector<8xf32>
    %134 = vector.shape_cast %133 : vector<8xf32> to vector<8x1xf32>
    %135 = arith.addf %86, %134 : vector<8x1xf32>
    %c0_85 = arith.constant 0 : index
    %c0_86 = arith.constant 0 : index
    %136 = vector.load %arg18[%c0_85, %c0_86] : memref<32x128xbf16, #tpu.memory_space<vmem>>, vector<32x128xbf16>
    %137 = arith.truncf %132 : vector<8x32xf32> to vector<8x32xbf16>
    %cst_87 = arith.constant dense<0.000000e+00> : vector<8x128xf32>
    %138 = tpu.matmul %137, %136, %cst_87 {dimension_numbers = #tpu.dot_dimension_numbers<[1], [0], [0], [1], [0, 0, 1, 1], [], []>} : vector<8x32xbf16>, vector<32x128xbf16>, vector<8x128xf32> -> vector<8x128xf32>
    %c0_88 = arith.constant 0 : index
    %c0_89 = arith.constant 0 : index
    %139 = vector.load %arg19[%c0_88, %c0_89] : memref<8x128xbf16, #tpu.memory_space<vmem>>, vector<8x128xbf16>
    %140 = arith.truncf %1 : vector<8x8xf32> to vector<8x8xbf16>
    %cst_90 = arith.constant dense<0.000000e+00> : vector<8x128xf32>
    %141 = tpu.matmul %140, %139, %cst_90 {dimension_numbers = #tpu.dot_dimension_numbers<[1], [0], [0], [1], [0, 0, 1, 1], [], []>} : vector<8x8xbf16>, vector<8x128xbf16>, vector<8x128xf32> -> vector<8x128xf32>
    %142 = arith.addf %138, %141 : vector<8x128xf32>
    %c0_91 = arith.constant 0 : index
    %c0_92 = arith.constant 0 : index
    %143 = vector.load %arg20[%c0_91, %c0_92] : memref<1x128xf32, #tpu.memory_space<vmem>>, vector<1x128xf32>
    %144 = vector.broadcast %143 : vector<1x128xf32> to vector<8x128xf32>
    %145 = arith.addf %142, %144 : vector<8x128xf32>
    %cst_93 = arith.constant 0.000000e+00 : f32
    %146 = vector.broadcast %cst_93 : f32 to vector<8x128xf32>
    %147 = arith.maximumf %145, %146 : vector<8x128xf32>
    %c0_94 = arith.constant 0 : index
    %c0_95 = arith.constant 0 : index
    %148 = vector.load %arg5[%c0_94, %c0_95] : memref<8x128xf32, #tpu.memory_space<vmem>>, vector<8x128xf32>
    %cst_96 = arith.constant 2.000000e+00 : f32
    %149 = vector.broadcast %cst_96 : f32 to vector<8x128xf32>
    %150 = arith.mulf %149, %148 : vector<8x128xf32>
    %151 = arith.mulf %147, %150 : vector<8x128xf32>
    %c0_97 = arith.constant 0 : index
    %c0_98 = arith.constant 0 : index
    %152 = vector.load %arg21[%c0_97, %c0_98] : memref<128x128xbf16, #tpu.memory_space<vmem>>, vector<128x128xbf16>
    %c0_99 = arith.constant 0 : index
    %c0_100 = arith.constant 0 : index
    %153 = vector.load %arg22[%c0_99, %c0_100] : memref<1x128xf32, #tpu.memory_space<vmem>>, vector<1x128xf32>
    %154 = arith.truncf %151 : vector<8x128xf32> to vector<8x128xbf16>
    %cst_101 = arith.constant dense<0.000000e+00> : vector<8x128xf32>
    %155 = tpu.matmul %154, %152, %cst_101 {dimension_numbers = #tpu.dot_dimension_numbers<[1], [0], [0], [1], [0, 0, 1, 1], [], []>} : vector<8x128xbf16>, vector<128x128xbf16>, vector<8x128xf32> -> vector<8x128xf32>
    %156 = vector.broadcast %153 : vector<1x128xf32> to vector<8x128xf32>
    %157 = arith.addf %155, %156 : vector<8x128xf32>
    %cst_102 = arith.constant 0.000000e+00 : f32
    %158 = vector.broadcast %cst_102 : f32 to vector<8x128xf32>
    %159 = arith.maximumf %157, %158 : vector<8x128xf32>
    %c0_103 = arith.constant 0 : index
    %c0_104 = arith.constant 0 : index
    %160 = vector.load %arg23[%c0_103, %c0_104] : memref<128x64xbf16, #tpu.memory_space<vmem>>, vector<128x64xbf16>
    %c0_105 = arith.constant 0 : index
    %c0_106 = arith.constant 0 : index
    %161 = vector.load %arg24[%c0_105, %c0_106] : memref<1x64xf32, #tpu.memory_space<vmem>>, vector<1x64xf32>
    %162 = arith.truncf %159 : vector<8x128xf32> to vector<8x128xbf16>
    %cst_107 = arith.constant dense<0.000000e+00> : vector<8x64xf32>
    %163 = tpu.matmul %162, %160, %cst_107 {dimension_numbers = #tpu.dot_dimension_numbers<[1], [0], [0], [1], [0, 0, 1, 1], [], []>} : vector<8x128xbf16>, vector<128x64xbf16>, vector<8x64xf32> -> vector<8x64xf32>
    %164 = vector.broadcast %161 : vector<1x64xf32> to vector<8x64xf32>
    %165 = arith.addf %163, %164 : vector<8x64xf32>
    %c0_108 = arith.constant 0 : index
    %c0_109 = arith.constant 0 : index
    %166 = vector.load %arg25[%c0_108, %c0_109] : memref<8x64xf32, #tpu.memory_space<vmem>>, vector<8x64xf32>
    tpu.vector_store %arg25[%c0_108, %c0_109], %165 {strides = array<i32>} : memref<8x64xf32, #tpu.memory_space<vmem>>, vector<8x64xf32>,
    %167 = arith.subf %165, %2 : vector<8x64xf32>
    %168 = arith.mulf %167, %167 : vector<8x64xf32>
    %cst_110 = arith.constant dense<0.000000e+00> : vector<8xf32>
    %169 = vector.multi_reduction <add>, %168, %cst_110 [1] : vector<8x64xf32> to vector<8xf32>
    %170 = vector.shape_cast %169 : vector<8xf32> to vector<8x1xf32>
    %cst_111 = arith.constant 5.000000e-01 : f32
    %171 = vector.broadcast %cst_111 : f32 to vector<8x1xf32>
    %172 = arith.mulf %171, %170 : vector<8x1xf32>
    %173 = arith.mulf %31, %31 : vector<8x32xf32>
    %174 = arith.addf %30, %173 : vector<8x32xf32>
    %cst_112 = arith.constant dense<0.000000e+00> : vector<8xf32>
    %175 = vector.multi_reduction <add>, %174, %cst_112 [1] : vector<8x32xf32> to vector<8xf32>
    %176 = vector.shape_cast %175 : vector<8xf32> to vector<8x1xf32>
    %cst_113 = arith.constant -5.000000e-01 : f32
    %177 = vector.broadcast %cst_113 : f32 to vector<8x1xf32>
    %178 = arith.mulf %177, %176 : vector<8x1xf32>
    %179 = arith.mulf %132, %132 : vector<8x32xf32>
    %cst_114 = arith.constant dense<0.000000e+00> : vector<8xf32>
    %180 = vector.multi_reduction <add>, %179, %cst_114 [1] : vector<8x32xf32> to vector<8xf32>
    %181 = vector.shape_cast %180 : vector<8xf32> to vector<8x1xf32>
    %cst_115 = arith.constant -5.000000e-01 : f32
    %182 = vector.broadcast %cst_115 : f32 to vector<8x1xf32>
    %183 = arith.mulf %182, %181 : vector<8x1xf32>
    %184 = arith.subf %178, %183 : vector<8x1xf32>
    %185 = arith.subf %184, %135 : vector<8x1xf32>
    %186 = arith.addf %172, %185 : vector<8x1xf32>
    %c0_116 = arith.constant 0 : index
    %c0_117 = arith.constant 0 : index
    %187 = vector.load %arg26[%c0_116, %c0_117] : memref<8x1xf32, #tpu.memory_space<vmem>>, vector<8x1xf32>
    tpu.vector_store %arg26[%c0_116, %c0_117], %186 {strides = array<i32>} : memref<8x1xf32, #tpu.memory_space<vmem>>, vector<8x1xf32>,
    return
  }
  func.func @transform_0(%arg0: i32) -> (i32, i32) {
    %c0_i32 = arith.constant 0 : i32
    %c0_i32_0 = arith.constant 0 : i32
    return %arg0, %c0_i32 : i32, i32
  }
  func.func @transform_1(%arg0: i32) -> (i32, i32) {
    %c0_i32 = arith.constant 0 : i32
    %c0_i32_0 = arith.constant 0 : i32
    return %arg0, %c0_i32 : i32, i32
  }
  func.func @transform_2(%arg0: i32) -> (i32, i32) {
    %c0_i32 = arith.constant 0 : i32
    %c0_i32_0 = arith.constant 0 : i32
    return %arg0, %c0_i32 : i32, i32
  }
  func.func @transform_3(%arg0: i32) -> (i32, i32) {
    %c0_i32 = arith.constant 0 : i32
    %c0_i32_0 = arith.constant 0 : i32
    return %arg0, %c0_i32 : i32, i32
  }
  func.func @transform_4(%arg0: i32) -> (i32, i32) {
    %c0_i32 = arith.constant 0 : i32
    %c0_i32_0 = arith.constant 0 : i32
    return %arg0, %c0_i32 : i32, i32
  }
  func.func @transform_5(%arg0: i32) -> (i32, i32) {
    %c0_i32 = arith.constant 0 : i32
    %c0_i32_0 = arith.constant 0 : i32
    %c0_i32_1 = arith.constant 0 : i32
    return %c0_i32, %c0_i32_0 : i32, i32
  }
  func.func @transform_6(%arg0: i32) -> (i32, i32) {
    %c0_i32 = arith.constant 0 : i32
    %c0_i32_0 = arith.constant 0 : i32
    %c0_i32_1 = arith.constant 0 : i32
    return %c0_i32, %c0_i32_0 : i32, i32
  }
  func.func @transform_7(%arg0: i32) -> (i32, i32) {
    %c0_i32 = arith.constant 0 : i32
    %c0_i32_0 = arith.constant 0 : i32
    %c0_i32_1 = arith.constant 0 : i32
    return %c0_i32, %c0_i32_0 : i32, i32
  }
  func.func @transform_8(%arg0: i32) -> (i32, i32) {
    %c0_i32 = arith.constant 0 : i32
    %c0_i32_0 = arith.constant 0 : i32
    %c0_i32_1 = arith.constant 0 : i32
    return %c0_i32, %c0_i32_0 : i32, i32
  }
  func.func @transform_9(%arg0: i32) -> (i32, i32) {
    %c0_i32 = arith.constant 0 : i32
    %c0_i32_0 = arith.constant 0 : i32
    %c0_i32_1 = arith.constant 0 : i32
    return %c0_i32, %c0_i32_0 : i32, i32
  }
  func.func @transform_10(%arg0: i32) -> (i32, i32) {
    %c0_i32 = arith.constant 0 : i32
    %c0_i32_0 = arith.constant 0 : i32
    %c0_i32_1 = arith.constant 0 : i32
    return %c0_i32, %c0_i32_0 : i32, i32
  }
  func.func @transform_11(%arg0: i32) -> (i32, i32, i32) {
    %c0_i32 = arith.constant 0 : i32
    %c0_i32_0 = arith.constant 0 : i32
    %c0_i32_1 = arith.constant 0 : i32
    %c0_i32_2 = arith.constant 0 : i32
    return %c0_i32, %c0_i32_0, %c0_i32_1 : i32, i32, i32
  }
  func.func @transform_12(%arg0: i32) -> (i32, i32, i32) {
    %c0_i32 = arith.constant 0 : i32
    %c0_i32_0 = arith.constant 0 : i32
    %c0_i32_1 = arith.constant 0 : i32
    %c0_i32_2 = arith.constant 0 : i32
    return %c0_i32, %c0_i32_0, %c0_i32_1 : i32, i32, i32
  }
  func.func @transform_13(%arg0: i32) -> (i32, i32, i32, i32) {
    %c0_i32 = arith.constant 0 : i32
    %c0_i32_0 = arith.constant 0 : i32
    %c0_i32_1 = arith.constant 0 : i32
    %c0_i32_2 = arith.constant 0 : i32
    %c0_i32_3 = arith.constant 0 : i32
    return %c0_i32, %c0_i32_0, %c0_i32_1, %c0_i32_2 : i32, i32, i32, i32
  }
  func.func @transform_14(%arg0: i32) -> (i32, i32, i32, i32) {
    %c0_i32 = arith.constant 0 : i32
    %c0_i32_0 = arith.constant 0 : i32
    %c0_i32_1 = arith.constant 0 : i32
    %c0_i32_2 = arith.constant 0 : i32
    %c0_i32_3 = arith.constant 0 : i32
    return %c0_i32, %c0_i32_0, %c0_i32_1, %c0_i32_2 : i32, i32, i32, i32
  }
  func.func @transform_15(%arg0: i32) -> (i32, i32, i32) {
    %c0_i32 = arith.constant 0 : i32
    %c0_i32_0 = arith.constant 0 : i32
    %c0_i32_1 = arith.constant 0 : i32
    %c0_i32_2 = arith.constant 0 : i32
    return %c0_i32, %c0_i32_0, %c0_i32_1 : i32, i32, i32
  }
  func.func @transform_16(%arg0: i32) -> (i32, i32, i32) {
    %c0_i32 = arith.constant 0 : i32
    %c0_i32_0 = arith.constant 0 : i32
    %c0_i32_1 = arith.constant 0 : i32
    %c0_i32_2 = arith.constant 0 : i32
    return %c0_i32, %c0_i32_0, %c0_i32_1 : i32, i32, i32
  }
  func.func @transform_17(%arg0: i32) -> (i32, i32) {
    %c0_i32 = arith.constant 0 : i32
    %c0_i32_0 = arith.constant 0 : i32
    %c0_i32_1 = arith.constant 0 : i32
    return %c0_i32, %c0_i32_0 : i32, i32
  }
  func.func @transform_18(%arg0: i32) -> (i32, i32) {
    %c0_i32 = arith.constant 0 : i32
    %c0_i32_0 = arith.constant 0 : i32
    %c0_i32_1 = arith.constant 0 : i32
    return %c0_i32, %c0_i32_0 : i32, i32
  }
  func.func @transform_19(%arg0: i32) -> (i32, i32) {
    %c0_i32 = arith.constant 0 : i32
    %c0_i32_0 = arith.constant 0 : i32
    %c0_i32_1 = arith.constant 0 : i32
    return %c0_i32, %c0_i32_0 : i32, i32
  }
  func.func @transform_20(%arg0: i32) -> (i32, i32) {
    %c0_i32 = arith.constant 0 : i32
    %c0_i32_0 = arith.constant 0 : i32
    %c0_i32_1 = arith.constant 0 : i32
    return %c0_i32, %c0_i32_0 : i32, i32
  }
  func.func @transform_21(%arg0: i32) -> (i32, i32) {
    %c0_i32 = arith.constant 0 : i32
    %c0_i32_0 = arith.constant 0 : i32
    %c0_i32_1 = arith.constant 0 : i32
    return %c0_i32, %c0_i32_0 : i32, i32
  }
  func.func @transform_22(%arg0: i32) -> (i32, i32) {
    %c0_i32 = arith.constant 0 : i32
    %c0_i32_0 = arith.constant 0 : i32
    %c0_i32_1 = arith.constant 0 : i32
    return %c0_i32, %c0_i32_0 : i32, i32
  }
  func.func @transform_23(%arg0: i32) -> (i32, i32) {
    %c0_i32 = arith.constant 0 : i32
    %c0_i32_0 = arith.constant 0 : i32
    %c0_i32_1 = arith.constant 0 : i32
    return %c0_i32, %c0_i32_0 : i32, i32
  }
  func.func @transform_24(%arg0: i32) -> (i32, i32) {
    %c0_i32 = arith.constant 0 : i32
    %c0_i32_0 = arith.constant 0 : i32
    return %arg0, %c0_i32 : i32, i32
  }
  func.func @transform_25(%arg0: i32) -> (i32, i32) {
    %c0_i32 = arith.constant 0 : i32
    %c0_i32_0 = arith.constant 0 : i32
    return %arg0, %c0_i32 : i32, i32
  }
}

</mosaic_0001>

<bundles_post_ra>
// kernel: cvae_iaf_forward.1
= control target key start
LH: loop header
LB: loop body
LE: loop exit
PB: predicated region body
PF: predicated region fallthrough
CT: control target
= control target key end

     0   :  { %s4536_s0 = inlined_call_operand.vmem [shape: f32[16,72], index: 0, kind: input, shape index: {}]   ;;  %s4537_s1 = inlined_call_operand.vmem [shape: f32[16,8], index: 1, kind: input, shape index: {}]   ;;  %s4538_s2 = inlined_call_operand.hbm [shape: f32[16,32], index: 2, kind: input, shape index: {}]   ;;  %s4539_s3 = inlined_call_operand.hbm [shape: f32[16,128], index: 3, kind: input, shape index: {}]   ;;  %s4540_s4 = inlined_call_operand.hbm [shape: f32[16,128], index: 4, kind: input, shape index: {}]   ;;  %s4541_s5 = inlined_call_operand.hbm [shape: bf16[72,128], index: 5, kind: input, shape index: {}]   ;;  %s4542_s6 = inlined_call_operand.hbm [shape: f32[1,128], index: 6, kind: input, shape index: {}]   ;;  %s4543_s7 = inlined_call_operand.vmem [shape: bf16[128,128], index: 7, kind: input, shape index: {}]   ;;  %s4544_s8 = inlined_call_operand.hbm [shape: f32[1,128], index: 8, kind: input, shape index: {}]   ;;  %s4545_s9 = inlined_call_operand.vmem [shape: bf16[128,64], index: 9, kind: input, shape index: {}]   ;;  %s4546_s10 = inlined_call_operand.hbm [shape: f32[1,64], index: 10, kind: input, shape index: {}]   ;;  %s4547_s11 = inlined_call_operand.hbm [shape: bf16[2,32,64], index: 11, kind: input, shape index: {}]   ;;  %s4548_s12 = inlined_call_operand.hbm [shape: f32[2,1,64], index: 12, kind: input, shape index: {}]   ;;  %s4549_s13 = inlined_call_operand.vmem [shape: bf16[2,1,64,64], index: 13, kind: input, shape index: {}]   ;;  %s4550_s14 = inlined_call_operand.hbm [shape: f32[2,1,1,64], index: 14, kind: input, shape index: {}]   ;;  %s4551_s15 = inlined_call_operand.vmem [shape: bf16[2,64,64], index: 15, kind: input, shape index: {}]   ;;  %s4552_s16 = inlined_call_operand.hbm [shape: f32[2,1,64], index: 16, kind: input, shape index: {}]   ;;  %s4553_s17 = inlined_call_operand.hbm [shape: bf16[32,128], index: 17, kind: input, shape index: {}]   ;;  %s4554_s18 = inlined_call_operand.vmem [shape: bf16[8,128], index: 18, kind: input, shape index: {}]   ;;  %s4555_s19 = inlined_call_operand.vmem [shape: f32[1,128], index: 19, kind: input, shape index: {}]   ;;  %s4556_s20 = inlined_call_operand.vmem [shape: bf16[128,128], index: 20, kind: input, shape index: {}]   ;;  %s4557_s21 = inlined_call_operand.vmem [shape: f32[1,128], index: 21, kind: input, shape index: {}]   ;;  %s4558_s22 = inlined_call_operand.vmem [shape: bf16[128,64], index: 22, kind: input, shape index: {}]   ;;  %s4559_s23 = inlined_call_operand.vmem [shape: f32[1,64], index: 23, kind: input, shape index: {}]   ;;  %s4560_s24 = inlined_call_operand.hbm [shape: f32[16,64], index: 24, kind: output, shape index: {0}]   ;;  %s4561_s25 = inlined_call_operand.vmem [shape: f32[16,1], index: 25, kind: output, shape index: {1}]  }
   0x1   :  { %4604 = sst [smem:[#allocation37_spill]] %s4536_s0 }
   0x2   :  { %4605 = sst [smem:[#allocation38_spill]] %s4537_s1 }
   0x3   :  { %4606 = sst [smem:[#allocation39_spill]] %s4538_s2 }
   0x4   :  { %4607 = sst [smem:[#allocation40_spill]] %s4539_s3 }
   0x5   :  { %4608 = sst [smem:[#allocation41_spill]] %s4540_s4 }
   0x6   :  { %4609 = sst [smem:[#allocation42_spill]] %s4541_s5 }
   0x7   :  { %4610 = sst [smem:[#allocation43_spill]] %s4542_s6 }
   0x8   :  { %4611 = sst [smem:[#allocation44_spill]] %s4543_s7 }
   0x9   :  { %4612 = sst [smem:[#allocation45_spill]] %s4544_s8 }
   0xa   :  { %4613 = sst [smem:[#allocation46_spill]] %s4545_s9 }
   0xb   :  { %4614 = sst [smem:[#allocation47_spill]] %s4546_s10 }
   0xc   :  { %4615 = sst [smem:[#allocation48_spill]] %s4547_s11 }
   0xd   :  { %4616 = sst [smem:[#allocation49_spill]] %s4550_s14 }
   0xe   :  { %4617 = sst [smem:[#allocation50_spill]] %s4551_s15 }
   0xf   :  { %4618 = sst [smem:[#allocation51_spill]] %s4554_s18 }
  0x10   :  { %4619 = sst [smem:[#allocation52_spill]] %s4555_s19 }
  0x11   :  { %4620 = sst [smem:[#allocation53_spill]] %s4556_s20 }
  0x12   :  { %4621 = sst [smem:[#allocation54_spill]] %s4557_s21 }
  0x13   :  { %4622 = sst [smem:[#allocation55_spill]] %s4558_s22 }
  0x14   :  { %4623 = sst [smem:[#allocation56_spill]] %s4559_s23 }
  0x15   :  { %4624 = sst [smem:[#allocation57_spill]] %s4560_s24 }
  0x16   :  { %4625 = sst [smem:[#allocation58_spill]] %s4561_s25 }
  0x17   :  { %31 = vsyncpa [#allocation3], 0 }
  0x18   :  { %33 = vsyncpa [#allocation3 + $0x1], 0 }
  0x19   :  { %34 = vsyncpa [#allocation6], 0 }
  0x1a   :  { %36 = vsyncpa [#allocation6 + $0x1], 0 }
  0x1b   :  { %37 = vsyncpa [#allocation9], 0 }
  0x1c   :  { %38 = vsyncpa [#allocation12], 0 }
  0x1d   :  { %39 = vsyncpa [#allocation15], 0 }
  0x1e   :  { %40 = vsyncpa [#allocation18], 0 }
  0x1f   :  { %41 = vsyncpa [#allocation21], 0 }
  0x20   :  { %42 = vsyncpa [#allocation4], 0 }
  0x21   :  { %44 = vsyncpa [#allocation4 + $0x1], 0  ;;  %s3743_s29 = smov 0   ;;  %s3745_s2 = smov 0  }
  0x22   :  { %s3747_s6 = smov 0   ;;  %s3749_s30 = smov 0  }
  0x23 LB: > { %4626 = sst [smem:[#allocation31_spill]] %s3578_s29  ;;  %s3592_s7 = smov [#allocation8]   ;;  %s3590_s30 = sphi %s3749_s30, %s4692_s30   ;;  %s3586_s6 = sphi %s3747_s6, %s4696_s6   ;;  %s3582_s2 = sphi %s3745_s2, %s4695_s2   ;;  %s3578_s29 = sphi %s3743_s29, %s4694_s29  }
  0x24   : > { %4627 = sst [smem:[#allocation32_spill]] %s3590_s30  ;;  %s648_s3 = sshll.u32 %s3592_s7, 4  ;;  %s3769_s3 = int_to_ptr.vmem [resolvable:$true] %s648_s3 }
  0x25   : > { %s3764_s26 = sadd.s32 4294967295, %s3590_s30   ;;  %p2551_p0 = scmp.ge.s32.totalorder %s3590_s30, 1 }
  0x26   : > { %p4574_p1 = scmp.eq.s32.totalorder %s3764_s26, 0  ;;  %p636_p2 = scmp.lt.s32.totalorder %s3590_s30, 3 }
  0x27   : > { %s3593_s8 = smov [#allocation11]   ;;  %s3594_s28 = smov [#allocation14]  }
  0x28   : > { %p3771_p3 = pnand %p2551_p0, %p636_p2  ;;  %s676_s27 = sshll.u32 %s3593_s8, 4  ;;  %s3784_s27 = int_to_ptr.vmem [resolvable:$true] %s676_s27 }
  0x29   : > { %s700_s9 = sshll.u32 %s3594_s28, 4  ;;  %s4630_s7 = sld [smem:[#allocation42_spill]]  ;;  %s3786_s9 = int_to_ptr.vmem [resolvable:$true] %s700_s9 }
  0x2a   : > { %s4628_s1 = scalar_select %p3771_p3, 1, 0 }
  0x2b   : > { %p2974_p5 = pneg %p3771_p3 }
  0x2d   : > { %p3780_p6 = pnand %p2974_p5, %p4574_p1 }
  0x2f   : > { %s4629_s4 = scalar_select %p3780_p6, 1, 0 }
  0x30   : > { %s3158_s25 = scalar_lea.hbm %s4630_s7, 576  ;;  %p3796_p8 = pneg %p3780_p6 }
  0x31   : > { %p3159_p7 = scmp.ne.s32.totalorder %s4630_s7, %s3158_s25  ;;  %p3165_p11 = scmp.lt.u32.totalorder %s3158_s25, %s4630_s7 }
  0x32   : > { %s4631_s8 = scalar_select %p3796_p8, 1, 0 }
  0x33   : > { %p3161_p9 = pnand %p3796_p8, %p3159_p7 }
  0x35   : > { %p3162_p10 = pneg %p3161_p9 }
  0x37   : > { %p3167_p12 = pnand %p3165_p11, %p3162_p10 }
  0x39   : > { %3170 = shalt.err (!%p3167_p12)
}
  0x3a   : > { %s3171_s23 = scalar_lea.vmem %s3769_s3, 576  ;;  %p3179_p5 = scmp.lt.s32.totalorder %s3769_s3, %s3769_s3 }
  0x3b   : > { %p3172_p13 = scmp.ne.s32.totalorder %s3769_s3, %s3171_s23  ;;  %p3180_p4 = scmp.lt.s32.totalorder %s3171_s23, %s3171_s23 }
  0x3d   : > { %p3174_p0 = pnand %p3172_p13, %p3796_p8  ;;  %p3181_p7 = por %p3180_p4, %p3179_p5 }
  0x3f   : > { %p3175_p2 = pneg %p3174_p0 }
  0x41   : > { %p3182_p9 = pnand %p3181_p7, %p3175_p2 }
  0x43   : > { %3185 = shalt.err (!%p3182_p9)
}
  0x44   : > { %s4576_s24 = smov 64   ;;  %s4577_s21 = smov 4  }
  0x45   : > { %2977 = dma.hbm_to_vmem [thread:$0]  (!%p3780_p6), %s4630_s7, 576, %s3769_s3, [#allocation9], %s4576_s24, %s4576_s24, %s4577_s21  }
  0x46   : > { %s4632_s19 = sld [smem:[#allocation45_spill]] }
  0x4c   : > { %s3186_s23 = scalar_lea.hbm %s4632_s19, 16 }
  0x4d   : > { %p3187_p4 = scmp.ne.s32.totalorder %s4632_s19, %s3186_s23  ;;  %p3193_p12 = scmp.lt.u32.totalorder %s3186_s23, %s4632_s19 }
  0x4f   : > { %p3189_p10 = pnand %p3187_p4, %p3796_p8 }
  0x51   : > { %p3190_p11 = pneg %p3189_p10 }
  0x53   : > { %p3195_p13 = pnand %p3193_p12, %p3190_p11 }
  0x55   : > { %3198 = shalt.err (!%p3195_p13)
}
  0x56   : > { %s3199_s3 = scalar_lea.vmem %s3784_s27, 16  ;;  %s3206_s20 = scalar_lea.vmem %s3784_s27, 32 }
  0x57   : > { %p3200_p0 = scmp.ne.s32.totalorder %s3784_s27, %s3199_s3  ;;  %p3207_p7 = scmp.lt.s32.totalorder %s3784_s27, %s3784_s27 }
  0x58   : > { %p3208_p9 = scmp.lt.s32.totalorder %s3206_s20, %s3199_s3 }
  0x59   : > { %p3202_p2 = pnand %p3200_p0, %p3796_p8 }
  0x5a   : > { %p3209_p4 = por %p3208_p9, %p3207_p7 }
  0x5b   : > { %p3203_p5 = pneg %p3202_p2 }
  0x5d   : > { %p3210_p10 = pnand %p3209_p4, %p3203_p5 }
  0x5f   : > { %3213 = shalt.err (!%p3210_p10)
}
  0x60   : > { %2983 = dma.hbm_to_vmem [thread:$0]  (!%p3780_p6), %s4632_s19, 16, %s3784_s27, [#allocation12]  }
  0x61   : > { %s4633_s11 = sld [smem:[#allocation48_spill]] }
  0x67   : > { %s3214_s5 = scalar_lea.hbm %s4633_s11, 512 }
  0x68   : > { %p3215_p11 = scmp.ne.s32.totalorder %s4633_s11, %s3214_s5  ;;  %p3221_p0 = scmp.lt.u32.totalorder %s3214_s5, %s4633_s11 }
  0x6a   : > { %p3217_p12 = pnand %p3215_p11, %p3796_p8 }
  0x6c   : > { %p3218_p13 = pneg %p3217_p12 }
  0x6e   : > { %p3223_p2 = pnand %p3221_p0, %p3218_p13 }
  0x70   : > { %3226 = shalt.err (!%p3223_p2)
}
  0x71   : > { %s3227_s27 = scalar_lea.vmem %s3786_s9, 512  ;;  %p3235_p4 = scmp.lt.s32.totalorder %s3786_s9, %s3786_s9 }
  0x72   : > { %p3228_p5 = scmp.ne.s32.totalorder %s3786_s9, %s3227_s27  ;;  %p3236_p10 = scmp.lt.s32.totalorder %s3227_s27, %s3227_s27 }
  0x74   : > { %p3230_p7 = pnand %p3228_p5, %p3796_p8  ;;  %p3237_p11 = por %p3236_p10, %p3235_p4 }
  0x76   : > { %p3231_p9 = pneg %p3230_p7 }
  0x78   : > { %p3238_p12 = pnand %p3237_p11, %p3231_p9 }
  0x7a   : > { %3241 = shalt.err (!%p3238_p12)
}
  0x7b   : > { %2989 = dma.hbm_to_vmem [thread:$0]  (!%p3780_p6), %s4633_s11, 512, %s3786_s9, [#allocation15], %s4576_s24, %s4576_s24, %s4577_s21  }
  0x7c   : > { %s3597_s18 = smov [#allocation17]   ;;  %s4634_s14 = sld [smem:[#allocation49_spill]] }
  0x7d   : > { %s729_s22 = sshll.u32 %s3597_s18, 4  ;;  %s730_s22 = int_to_ptr.vmem [resolvable:$true] %s729_s22 }
  0x82   : > { %s3242_s0 = scalar_lea.hbm %s4634_s14, 32 }
  0x83   : > { %p3243_p13 = scmp.ne.s32.totalorder %s4634_s14, %s3242_s0  ;;  %p3249_p5 = scmp.lt.u32.totalorder %s3242_s0, %s4634_s14 }
  0x85   : > { %p3245_p0 = pnand %p3243_p13, %p3796_p8 }
  0x87   : > { %p3246_p2 = pneg %p3245_p0 }
  0x89   : > { %p3251_p7 = pnand %p3249_p5, %p3246_p2 }
  0x8b   : > { %3254 = shalt.err (!%p3251_p7)
}
  0x8c   : > { %s3255_s9 = scalar_lea.vmem %s730_s22, 32  ;;  %p3263_p11 = scmp.lt.s32.totalorder %s730_s22, %s730_s22 }
  0x8d   : > { %p3256_p9 = scmp.ne.s32.totalorder %s730_s22, %s3255_s9  ;;  %p3264_p12 = scmp.lt.s32.totalorder %s3255_s9, %s3255_s9 }
  0x8f   : > { %p3258_p4 = pnand %p3256_p9, %p3796_p8  ;;  %p3265_p1 = por %p3264_p12, %p3263_p11 }
  0x91   : > { %p3259_p10 = pneg %p3258_p4 }
  0x93   : > { %p3266_p3 = pnand %p3265_p1, %p3259_p10 }
  0x95   : > { %3269 = shalt.err (!%p3266_p3)
}
  0x96   : > { %s4578_s20 = smov 16   ;;  %s4580_s15 = smov 1  }
  0x97   : > { %2995 = dma.hbm_to_vmem [thread:$0]  (!%p3780_p6), %s4634_s14, 32, %s730_s22, [#allocation18], %s4578_s20, %s4578_s20, %s4580_s15  }
  0x98   : > { %s2550_s5 = sadd.s32 4294967294, %s3590_s30   ;;  %s3893_s0 = sadd.s32 1, %s3590_s30  }
  0x99   : > { %4635 = sst [smem:[#allocation33_spill]] %s3893_s0  ;;  %s106_s28 = ssub.s32 %s3590_s30, %s3893_s0 }
  0x9a   : > { %s109_s23 = sadd.s32 1, %s3586_s6  ;;  %p107_p1 = scmp.eq.s32.totalorder %s106_s28, 0 }
  0x9b   : > { %p116_p3 = scmp.ne.s32.totalorder %s3586_s6, %s3582_s2  ;;  %p117_p13 = scmp.eq.s32.totalorder %s3590_s30, 0 }
  0x9c   : > { %p122_p0 = scmp.ne.s32.totalorder %s3582_s2, %s3578_s29  ;;  %p4637_p5 = scmp.eq.s32.totalorder %s3764_s26, 0 }
  0x9d   : > { %s3904_s3 = scalar_select %p107_p1, %s3586_s6, %s109_s23  }
  0x9e   : > { %p118_p2 = por %p117_p13, %p116_p3  ;;  %p3908_p7 = por %p4637_p5, %p122_p0 }
  0x9f   : > { %4636 = sst [smem:[#allocation34_spill]] %s3904_s3  ;;  %p597_p9 = scmp.eq.s32.totalorder %s3764_s26, 1 }
  0xa0   : > { %s4638_s27 = scalar_select %p3908_p7, 1, 0 }
  0xa1   : > { %p603_p4 = scmp.eq.s32.totalorder %s2550_s5, 1  ;;  %p3025_p10 = scmp.lt.s32.totalorder %s3590_s30, 2 }
  0xa2   : > { %s4582_s22 = sand.u32 1, %s3586_s6   ;;  %p3915_p11 = por %p597_p9, %p116_p3 }
  0xa3   : > { %p3919_p12 = por %p603_p4, %p122_p0  ;;  %s3925_s25 = sshll.u32 %s4582_s22, 3 }
  0xa4   : > { %s4639_s9 = scalar_select %p3915_p11, 1, 0 }
  0xa5   : > { %s4641_s18 = scalar_select %p3919_p12, 1, 0 }
  0xa6   : > { %4640 = sst [smem:[#allocation35_spill]] %s4639_s9  ;;  %s3928_s28 = sshll.u32 %s3590_s30, 7 }
  0xa7   : > { %4642 = sst [smem:[#allocation36_spill]] %s4641_s18  ;;  %p3930_p1 = pnand %p3025_p10, %p118_p2 }
  0xa8   : > { %s822_s5 = sand.u32 1, %s3590_s30   ;;  %s4644_s20 = sld [smem:[#allocation40_spill]] }
  0xa9   : > { %s4643_s23 = scalar_select %p3930_p1, 1, 0 }
  0xaa   : > { %s826_s22 = scalar_lea.vmem [#allocation5], %s3925_s25  ;;  %s3600_s11 = smov [#allocation10]  }
  0xab   : > { %s833_s7 = sshll.u32 %s826_s22, 4  ;;  %s3944_s14 = sshll.u32 %s3600_s11, 4  ;;  %s3942_s7 = int_to_ptr.vmem [resolvable:$true] %s833_s7  ;;  %s663_s14 = int_to_ptr.vmem [resolvable:$true] %s3944_s14 }
  0xac   : > { %s3946_s19 = scalar_lea.sflag [#allocation6], %s822_s5  ;;  %p3952_p13 = pneg %p3930_p1 }
  0xae   : > { %s3939_s15 = scalar_lea.hbm %s4644_s20, %s3928_s28  ;;  %s3275_s0 = scalar_lea.hbm %s4644_s20, 256 }
  0xaf   : > { %s3270_s3 = scalar_lea.hbm %s3939_s15, 128  ;;  %p3276_p5 = scmp.lt.u32.totalorder %s3939_s15, %s4644_s20 }
  0xb0   : > { %p3271_p3 = scmp.ne.s32.totalorder %s3939_s15, %s3270_s3  ;;  %p3277_p9 = scmp.lt.u32.totalorder %s3275_s0, %s3270_s3 }
  0xb1   : > { %s4645_s24 = scalar_select %p3952_p13, 1, 0 }
  0xb2   : > { %p3273_p0 = pnand %p3952_p13, %p3271_p3  ;;  %p3278_p4 = por %p3277_p9, %p3276_p5 }
  0xb3   : > { %p3279_p10 = scmp.lt.u32.totalorder %s3270_s3, %s3939_s15 }
  0xb4   : > { %p3274_p2 = pneg %p3273_p0 }
  0xb5   : > { %p3280_p12 = por %p3279_p10, %p3278_p4 }
  0xb7   : > { %p3281_p11 = pnand %p3280_p12, %p3274_p2 }
  0xb9   : > { %3284 = shalt.err (!%p3281_p11)
}
  0xba   : > { %s3285_s5 = scalar_lea.vmem %s3942_s7, 128  ;;  %s3601_s21 = smov [#allocation5]  }
  0xbb   : > { %p3286_p3 = scmp.ne.s32.totalorder %s3942_s7, %s3285_s5  ;;  %s3290_s22 = sshll.u32 %s3601_s21, 4  ;;  %s3291_s22 = int_to_ptr.vmem [resolvable:$false] %s3290_s22 }
  0xbc   : > { %s3292_s30 = scalar_lea.vmem %s3291_s22, 256  ;;  %p3293_p6 = scmp.lt.s32.totalorder %s3942_s7, %s3291_s22 }
  0xbd   : > { %p3288_p0 = pnand %p3286_p3, %p3952_p13  ;;  %p3294_p8 = scmp.lt.s32.totalorder %s3292_s30, %s3285_s5 }
  0xbf   : > { %p3289_p7 = pneg %p3288_p0  ;;  %p3295_p5 = por %p3294_p8, %p3293_p6 }
  0xc1   : > { %p3296_p9 = pnand %p3295_p5, %p3289_p7 }
  0xc3   : > { %3299 = shalt.err (!%p3296_p9)
}
  0xc4   : > { %3008 = dma.hbm_to_vmem [thread:$0]  (!%p3930_p1), %s3939_s15, 128, %s3942_s7, %s3946_s19  }
  0xc5   : > { %s4646_s11 = sld [smem:[#allocation43_spill]]  ;;  %p4647_p6 = scmp.ne.s32.totalorder %s4631_s8, 0 }
  0xcb   : > { %s3300_s21 = scalar_lea.hbm %s4646_s11, 16 }
  0xcc   : > { %p3301_p11 = scmp.ne.s32.totalorder %s4646_s11, %s3300_s21  ;;  %p3307_p12 = scmp.lt.u32.totalorder %s3300_s21, %s4646_s11 }
  0xce   : > { %p3303_p8 = pnand %p3301_p11, %p4647_p6 }
  0xd0   : > { %p3304_p7 = pneg %p3303_p8 }
  0xd2   : > { %p3309_p2 = pnand %p3307_p12, %p3304_p7 }
  0xd4   : > { %3312 = shalt.err (!%p3309_p2)
}
  0xd5   : > { %s3313_s30 = scalar_lea.vmem %s663_s14, 16  ;;  %s3320_s7 = scalar_lea.vmem %s663_s14, 32 }
  0xd6   : > { %p3314_p4 = scmp.ne.s32.totalorder %s663_s14, %s3313_s30  ;;  %p3321_p0 = scmp.lt.s32.totalorder %s663_s14, %s663_s14 }
  0xd7   : > { %p3322_p5 = scmp.lt.s32.totalorder %s3320_s7, %s3313_s30 }
  0xd8   : > { %p3316_p10 = pnand %p3314_p4, %p4647_p6 }
  0xd9   : > { %p3323_p9 = por %p3322_p5, %p3321_p0 }
  0xda   : > { %p3317_p3 = pneg %p3316_p10 }
  0xdc   : > { %p3324_p1 = pnand %p3323_p9, %p3317_p3 }
  0xde   : > { %3327 = shalt.err (!%p3324_p1)
}
  0xdf   : > { %p4648_p11 = scmp.ne.s32.totalorder %s4629_s4, 0  ;;  %s3602_s18 = smov [#allocation13]  }
  0xe0   : > { %s690_s0 = sshll.u32 %s3602_s18, 4  ;;  %s3603_s3 = smov [#allocation16]   ;;  %s691_s0 = int_to_ptr.vmem [resolvable:$true] %s690_s0 }
  0xe1   : > { %2980 = dma.hbm_to_vmem [thread:$0]  (!%p4648_p11), %s4646_s11, 16, %s663_s14, [#allocation9]  }
  0xe2   : > { %s713_s21 = sshll.u32 %s3603_s3, 4  ;;  %s4649_s10 = sld [smem:[#allocation47_spill]]  ;;  %s714_s21 = int_to_ptr.vmem [resolvable:$true] %s713_s21 }
  0xe8   : > { %s3328_s29 = scalar_lea.hbm %s4649_s10, 16 }
  0xe9   : > { %p3329_p1 = scmp.ne.s32.totalorder %s4649_s10, %s3328_s29  ;;  %p3335_p12 = scmp.lt.u32.totalorder %s3328_s29, %s4649_s10 }
  0xeb   : > { %p3331_p8 = pnand %p3329_p1, %p4647_p6 }
  0xed   : > { %p3332_p7 = pneg %p3331_p8 }
  0xef   : > { %p3337_p2 = pnand %p3335_p12, %p3332_p7 }
  0xf1   : > { %3340 = shalt.err (!%p3337_p2)
}
  0xf2   : > { %s3341_s14 = scalar_lea.vmem %s691_s0, 16  ;;  %s3348_s15 = scalar_lea.vmem %s691_s0, 32 }
  0xf3   : > { %p3342_p4 = scmp.ne.s32.totalorder %s691_s0, %s3341_s14  ;;  %p3349_p0 = scmp.lt.s32.totalorder %s691_s0, %s691_s0 }
  0xf4   : > { %p3350_p5 = scmp.lt.s32.totalorder %s3348_s15, %s3341_s14 }
  0xf5   : > { %p3344_p10 = pnand %p3342_p4, %p4647_p6 }
  0xf6   : > { %p3351_p9 = por %p3350_p5, %p3349_p0 }
  0xf7   : > { %p3345_p3 = pneg %p3344_p10 }
  0xf9   : > { %p3352_p13 = pnand %p3351_p9, %p3345_p3 }
  0xfb   : > { %3355 = shalt.err (!%p3352_p13)
}
  0xfc   : > { %2986 = dma.hbm_to_vmem [thread:$0]  (!%p4648_p11), %s4649_s10, 16, %s691_s0, [#allocation12]  }
  0xfd   : > { %s3356_s5 = scalar_lea.hbm %s4548_s12, 32 }
  0xfe   : > { %p3357_p1 = scmp.ne.s32.totalorder %s4548_s12, %s3356_s5  ;;  %p3363_p13 = scmp.lt.u32.totalorder %s3356_s5, %s4548_s12 }
 0x100   : > { %p3359_p8 = pnand %p3357_p1, %p4647_p6 }
 0x102   : > { %p3360_p7 = pneg %p3359_p8 }
 0x104   : > { %p3365_p12 = pnand %p3363_p13, %p3360_p7 }
 0x106   : > { %3368 = shalt.err (!%p3365_p12)
}
 0x107   : > { %s3369_s14 = scalar_lea.vmem %s714_s21, 32  ;;  %p3377_p3 = scmp.lt.s32.totalorder %s714_s21, %s714_s21 }
 0x108   : > { %p3370_p2 = scmp.ne.s32.totalorder %s714_s21, %s3369_s14  ;;  %p3378_p0 = scmp.lt.s32.totalorder %s3369_s14, %s3369_s14 }
 0x10a   : > { %p3372_p4 = pnand %p3370_p2, %p4647_p6  ;;  %p3379_p5 = por %p3378_p0, %p3377_p3 }
 0x10c   : > { %p3373_p10 = pneg %p3372_p4 }
 0x10e   : > { %p3380_p9 = pnand %p3379_p5, %p3373_p10 }
 0x110   : > { %3383 = shalt.err (!%p3380_p9)
}
 0x111   : > { %s4650_s0 = smov 1   ;;  %s4651_s15 = smov 16  }
 0x112   : > { %2992 = dma.hbm_to_vmem [thread:$0]  (!%p4648_p11), %s4548_s12, 32, %s714_s21, [#allocation15], %s4651_s15, %s4651_s15, %s4650_s0  }
 0x113   : > { %s3604_s29 = smov [#allocation19]   ;;  %s3605_s5 = smov [#allocation20]  }
 0x114   : > { %s745_s9 = sshll.u32 %s3604_s29, 4  ;;  %s758_s22 = sshll.u32 %s3605_s5, 4  ;;  %s746_s9 = int_to_ptr.vmem [resolvable:$true] %s745_s9  ;;  %s759_s22 = int_to_ptr.vmem [resolvable:$true] %s758_s22 }
 0x115   : > { %s3384_s20 = scalar_lea.hbm %s4552_s16, 32 }
 0x116   : > { %p3385_p1 = scmp.ne.s32.totalorder %s4552_s16, %s3384_s20  ;;  %p3391_p13 = scmp.lt.u32.totalorder %s3384_s20, %s4552_s16 }
 0x118   : > { %p3387_p8 = pnand %p3385_p1, %p4647_p6 }
 0x11a   : > { %p3388_p7 = pneg %p3387_p8 }
 0x11c   : > { %p3393_p12 = pnand %p3391_p13, %p3388_p7 }
 0x11e   : > { %3396 = shalt.err (!%p3393_p12)
}
 0x11f   : > { %s3397_s21 = scalar_lea.vmem %s746_s9, 32  ;;  %p3405_p3 = scmp.lt.s32.totalorder %s746_s9, %s746_s9 }
 0x120   : > { %p3398_p2 = scmp.ne.s32.totalorder %s746_s9, %s3397_s21  ;;  %p3406_p0 = scmp.lt.s32.totalorder %s3397_s21, %s3397_s21 }
 0x122   : > { %p3400_p4 = pnand %p3398_p2, %p4647_p6  ;;  %p3407_p5 = por %p3406_p0, %p3405_p3 }
 0x124   : > { %p3401_p10 = pneg %p3400_p4 }
 0x126   : > { %p3408_p9 = pnand %p3407_p5, %p3401_p10 }
 0x128   : > { %3411 = shalt.err (!%p3408_p9)
}
 0x129   : > { %2998 = dma.hbm_to_vmem [thread:$0]  (!%p4648_p11), %s4552_s16, 32, %s746_s9, [#allocation18], %s4651_s15, %s4651_s15, %s4650_s0  }
 0x12a   : > { %s3412_s5 = scalar_lea.hbm %s4553_s17, 256 }
 0x12b   : > { %p3413_p1 = scmp.ne.s32.totalorder %s4553_s17, %s3412_s5  ;;  %p3419_p13 = scmp.lt.u32.totalorder %s3412_s5, %s4553_s17 }
 0x12d   : > { %p3415_p8 = pnand %p3413_p1, %p4647_p6 }
 0x12f   : > { %p3416_p7 = pneg %p3415_p8 }
 0x131   : > { %p3421_p12 = pnand %p3419_p13, %p3416_p7 }
 0x133   : > { %3424 = shalt.err (!%p3421_p12)
}
 0x134   : > { %s3425_s18 = scalar_lea.vmem %s759_s22, 256  ;;  %p3433_p3 = scmp.lt.s32.totalorder %s759_s22, %s759_s22 }
 0x135   : > { %p3426_p2 = scmp.ne.s32.totalorder %s759_s22, %s3425_s18  ;;  %p3434_p0 = scmp.lt.s32.totalorder %s3425_s18, %s3425_s18 }
 0x137   : > { %p3428_p4 = pnand %p3426_p2, %p4647_p6  ;;  %p3435_p5 = por %p3434_p0, %p3433_p3 }
 0x139   : > { %p3429_p10 = pneg %p3428_p4 }
 0x13b   : > { %p3436_p9 = pnand %p3435_p5, %p3429_p10 }
 0x13d   : > { %3439 = shalt.err (!%p3436_p9)
}
 0x13e   : > { %s4652_s0 = smov 4   ;;  %s4653_s15 = smov 64  }
 0x13f   : > { %3001 = dma.hbm_to_vmem [thread:$0]  (!%p4648_p11), %s4553_s17, 256, %s759_s22, [#allocation21], %s4653_s15, %s4653_s15, %s4652_s0  }
 0x140   : > { %s4654_s11 = sld [smem:[#allocation39_spill]]  ;;  %s808_s4 = scalar_lea.vmem [#allocation2], %s3925_s25 }
 0x141   : > { %s815_s29 = sshll.u32 %s808_s4, 4  ;;  %s4655_s7 = sld [smem:[#allocation41_spill]]  ;;  %s4083_s29 = int_to_ptr.vmem [resolvable:$true] %s815_s29 }
 0x142   : > { %s4656_s14 = sand.u32 1, %s3586_s6   ;;  %p4657_p11 = scmp.ne.s32.totalorder %s4645_s24, 0 }
 0x143   : > { %s805_s22 = scalar_lea.sflag [#allocation3], %s4656_s14 }
 0x146   : > { %s4080_s3 = scalar_lea.hbm %s4654_s11, %s3928_s28  ;;  %s3445_s9 = scalar_lea.hbm %s4654_s11, 256 }
 0x147   : > { %s4089_s20 = scalar_lea.hbm %s4655_s7, %s3928_s28  ;;  %s3440_s18 = scalar_lea.hbm %s4080_s3, 128 }
 0x148   : > { %p3441_p6 = scmp.ne.s32.totalorder %s4080_s3, %s3440_s18  ;;  %p3446_p7 = scmp.lt.u32.totalorder %s4080_s3, %s4654_s11 }
 0x149   : > { %p3447_p13 = scmp.lt.u32.totalorder %s3445_s9, %s3440_s18  ;;  %p3449_p2 = scmp.lt.u32.totalorder %s3440_s18, %s4080_s3 }
 0x14a   : > { %p3443_p1 = pnand %p3441_p6, %p4657_p11 }
 0x14b   : > { %p3448_p12 = por %p3447_p13, %p3446_p7 }
 0x14c   : > { %p3444_p8 = pneg %p3443_p1 }
 0x14d   : > { %p3450_p4 = por %p3449_p2, %p3448_p12 }
 0x14f   : > { %p3451_p10 = pnand %p3450_p4, %p3444_p8 }
 0x151   : > { %3454 = shalt.err (!%p3451_p10)
}
 0x152   : > { %s3455_s28 = scalar_lea.vmem %s4083_s29, 128  ;;  %s3606_s10 = smov [#allocation2]  }
 0x153   : > { %p3456_p3 = scmp.ne.s32.totalorder %s4083_s29, %s3455_s28  ;;  %s3460_s4 = sshll.u32 %s3606_s10, 4  ;;  %s3461_s4 = int_to_ptr.vmem [resolvable:$false] %s3460_s4 }
 0x154   : > { %s3462_s5 = scalar_lea.vmem %s3461_s4, 256  ;;  %p3463_p9 = scmp.lt.s32.totalorder %s4083_s29, %s3461_s4 }
 0x155   : > { %p3458_p0 = pnand %p3456_p3, %p4657_p11  ;;  %p3464_p6 = scmp.lt.s32.totalorder %s3462_s5, %s3455_s28 }
 0x157   : > { %p3459_p5 = pneg %p3458_p0  ;;  %p3465_p1 = por %p3464_p6, %p3463_p9 }
 0x159   : > { %p3466_p7 = pnand %p3465_p1, %p3459_p5 }
 0x15b   : > { %3469 = shalt.err (!%p3466_p7)
}
 0x15c   : > { %p4658_p8 = scmp.ne.s32.totalorder %s4643_s23, 0  ;;  %s844_s30 = scalar_lea.vmem [#allocation7], %s3925_s25 }
 0x15d   : > { %s851_s14 = sshll.u32 %s844_s30, 4  ;;  %s3470_s18 = scalar_lea.hbm %s4089_s20, 128  ;;  %s852_s14 = int_to_ptr.vmem [resolvable:$true] %s851_s14 }
 0x15e   : > { %3005 = dma.hbm_to_vmem [thread:$0]  (!%p4658_p8), %s4080_s3, 128, %s4083_s29, %s805_s22  }
 0x15f   : > { %p3471_p13 = scmp.ne.s32.totalorder %s4089_s20, %s3470_s18  ;;  %s3475_s9 = scalar_lea.hbm %s4655_s7, 256 }
 0x160   : > { %p3476_p4 = scmp.lt.u32.totalorder %s4089_s20, %s4655_s7  ;;  %p3477_p10 = scmp.lt.u32.totalorder %s3475_s9, %s3470_s18 }
 0x161   : > { %p3473_p12 = pnand %p3471_p13, %p4657_p11  ;;  %p3479_p0 = scmp.lt.u32.totalorder %s3470_s18, %s4089_s20 }
 0x162   : > { %p3478_p3 = por %p3477_p10, %p3476_p4 }
 0x163   : > { %p3474_p2 = pneg %p3473_p12 }
 0x164   : > { %p3480_p5 = por %p3479_p0, %p3478_p3 }
 0x166   : > { %p3481_p9 = pnand %p3480_p5, %p3474_p2 }
 0x168   : > { %3484 = shalt.err (!%p3481_p9)
}
 0x169   : > { %s3485_s25 = scalar_lea.vmem %s852_s14, 128  ;;  %s3607_s3 = smov [#allocation7]  }
 0x16a   : > { %p3486_p6 = scmp.ne.s32.totalorder %s852_s14, %s3485_s25  ;;  %s3490_s29 = sshll.u32 %s3607_s3, 4  ;;  %s3491_s29 = int_to_ptr.vmem [resolvable:$false] %s3490_s29 }
 0x16b   : > { %s3492_s22 = scalar_lea.vmem %s3491_s29, 256  ;;  %p3493_p13 = scmp.lt.s32.totalorder %s852_s14, %s3491_s29 }
 0x16c   : > { %p3488_p1 = pnand %p3486_p6, %p4657_p11  ;;  %p3494_p12 = scmp.lt.s32.totalorder %s3492_s22, %s3485_s25 }
 0x16e   : > { %p3489_p7 = pneg %p3488_p1  ;;  %p3495_p8 = por %p3494_p12, %p3493_p13 }
 0x170   : > { %p3496_p4 = pnand %p3495_p8, %p3489_p7 }
 0x172   : > { %3499 = shalt.err (!%p3496_p4)
}
 0x173   : > { %p4659_p10 = scmp.ne.s32.totalorder %s4643_s23, 0  ;;  %p4660_p2 = scmp.ne.s32.totalorder %s4628_s1, 0 }
 0x174   : > { %s4136_s24 = sand.u32 (!%p4660_p2), 1, %s3582_s2   ;;  %p4661_p11 = scmp.ne.s32.totalorder (!%p4660_p2), %s4638_s27, 0 }
 0x175   : > { %3011 = dma.hbm_to_vmem [thread:$0]  (!%p4659_p10), %s4089_s20, 128, %s852_s14, %s3946_s19  }
 0x176   : > { %860 = sbr.rel (%p4660_p2) target bundleno = 3797 (0xed5), region = 116  ;;  %s4139_s28 = sshll.u32 (!%p4660_p2), %s4136_s24, 3 }
 0x177   : > { %s863_s10 = scalar_lea.sflag (!%p4660_p2), [#allocation3], %s4136_s24  ;;  %s866_s4 = scalar_lea.vmem (!%p4660_p2), [#allocation2], %s4139_s28 }
 0x17d   : > { %3545 = dma.done.wait (%p4661_p11), %s863_s10, 128  }
 0x17e   : > { %3547 = vsyncadd (%p4661_p11), %s863_s10, 4294967168  ;;  %s871_s19 = sand.u32 1, %s3764_s26   ;;  %s875_s23 = scalar_lea.vmem [#allocation5], %s4139_s28 }
 0x17f   : > { %s872_s1 = scalar_lea.sflag [#allocation6], %s871_s19 }
 0x180   : > { %3549 = dma.done.wait (%p4661_p11), %s872_s1, 256  }
 0x181   : > { %3551 = vsyncadd (%p4661_p11), %s872_s1, 4294967040  ;;  %s884_s20 = scalar_lea.vmem [#allocation7], %s4139_s28  ;;  %p4662_p8 = scmp.eq.s32.totalorder %s3764_s26, 0 }
 0x183   : > { %3553 = dma.done.wait (%p4662_p8), [#allocation9], 592   ;;  %p4663_p3 = pmov %p4662_p8 }
 0x185   : > { %3555 = vsyncadd (%p4663_p3), [#allocation9], 4294966704  ;;  %p4664_p0 = pmov %p4663_p3 }
 0x187   : > { %3557 = dma.done.wait (%p4664_p0), [#allocation12], 32   ;;  %p4665_p5 = pmov %p4664_p0 }
 0x188   : > { %p4666_p9 = pmov %p4664_p0 }
 0x189   : > { %3559 = vsyncadd (%p4665_p5), [#allocation12], 4294967264 }
 0x18a   : > { %3561 = dma.done.wait (%p4666_p9), [#allocation15], 544   ;;  %p4667_p6 = pmov %p4664_p0 }
 0x18b   : > { %p4668_p1 = pmov %p4664_p0 }
 0x18c   : > { %3563 = vsyncadd (%p4667_p6), [#allocation15], 4294966752 }
 0x18d   : > { %3565 = dma.done.wait (%p4668_p1), [#allocation18], 64   ;;  %p4669_p7 = pmov %p4664_p0 }
 0x18e   : > { %p4670_p13 = pmov %p4664_p0 }
 0x18f   : > { %3567 = vsyncadd (%p4669_p7), [#allocation18], 4294967232 }
 0x190   : > { %3569 = dma.done.wait (%p4670_p13), [#allocation21], 256   ;;  %p4671_p12 = pmov %p4664_p0 }
 0x191   : > { %v3608_v0 = vmov 0.0   ;;  %vm3609_vm0 = vmmov 0   ;;  %p1009_p4 = scmp.lt.s32.totalorder %s3764_s26, 1  ;;  %v3085_v1 = vld [vmem:[#allocation8] sm:$0xff]   ;;  %v3086_v2 = vld [vmem:[#allocation8 + $0x8] sm:$0xff]   ;;  %v3087_v3 = vld [vmem:[#allocation8 + $0x10] sm:$0xff]  }
 0x192   : > { %3571 = vsyncadd (%p4671_p12), [#allocation21], 4294967040  ;;  %2758 = vmatprep.subr.bf16.mxu0 %v3608_v0  ;;  %2768 = vmatprep.mubr.msk.bf16.mxu0 %vm3609_vm0, %v3608_v0  ;;  %s4672_s18 = sld [smem:[#allocation44_spill]]  ;;  %v3089_v5 = vld [vmem:[#allocation8 + $0x20] ss:$0 sps:$4 sm:$0xff]   ;;  %vm1072_vm1 = vcmask 1043456  }
 0x193   : > { %2772 = vmatprep.subr.bf16.mxu1 %v3608_v0  ;;  %2788 = vmatprep.mubr.msk.bf16.mxu1 %vm3609_vm0, %v3608_v0  ;;  %s1010_s27 = scalar_select %p1009_p4, %s3764_s26, 1  ;;  %v3088_v7 = vld [vmem:[#allocation8 + $0x18] sm:$0xff]   ;;  %vm1068_vm2 = vcmask 588800   ;;  %v1074_v8 = vsel %vm1072_vm1, %v3089_v5, 0  ;;  %v2585_v23 = vld [vmem:[#allocation10] ss:$0 sm:$0xff] }
 0x194   : > { %2759 = vmatpush3.bf16.msra.mxu0 %v3085_v1  ;;  %s4673_s8 = sld [smem:[#allocation37_spill]]  ;;  %v1117_v24 = vld [vmem:[%s875_s23] sm:$0xff]  ;;  %v4271_v36 = vld [vmem:[%s866_s4] sm:$0xff]  ;;  %s3611_s4 = smov 96   ;;  %vm1383_vm3 = vcmask 261120   ;;  %vm1468_vm4 = vcmask 523264  }
 0x195   : > { %2760 = vmatprep.subr.bf16.mxu0 %v3608_v0  ;;  %s4183_s5 = sshll.u32 %s1010_s27, 3  ;;  %v1118_v27 = vmul.f32 2.0, %v1117_v24  ;;  %v2592_v37 = vld [vmem:[#allocation11] ss:$0 sm:$0xff]  ;;  %v3106_v45 = vld [vmem:[#allocation14] sm:$0xff]   ;;  %v3107_v54 = vld [vmem:[#allocation14 + $0x8] sm:$0xff]  }
 0x196   : > { %v2601_v46 = vld [vmem:[#allocation13] ss:$0 sm:$0xff]  ;;  %v3108_v60 = vld [vmem:[%s4549_s13] sm:$0xff]   ;;  %v3109_v62 = vld [vmem:[%s4549_s13 + $0x8] sm:$0xff]   ;;  %s4675_s15 = sld [smem:[#allocation50_spill]]  ;;  %s4676_s14 = sld [smem:[#allocation51_spill]] }
 0x197   : > { %v3110_v63 = vld [vmem:[%s4549_s13 + $0x10] sm:$0xff]   ;;  %v3111_v1 = vld [vmem:[%s4549_s13 + $0x18] sm:$0xff]   ;;  %s4677_s23 = sld [smem:[#allocation38_spill]]  ;;  %vm1905_vm5 = vcmask 64512   ;;  %s4678_s3 = sld [smem:[#allocation53_spill]] }
 0x198   : > { %v3090_v4 = vld [vmem:[%s4672_s18] sm:$0xff]   ;;  %2761 = vmatpush3.bf16.msra.mxu0 %v3086_v2  ;;  %v3091_v6 = vld [vmem:[%s4672_s18 + $0x8] sm:$0xff]   ;;  %v3092_v9 = vld [vmem:[%s4672_s18 + $0x10] sm:$0xff]   ;;  %s4679_s10 = sld [smem:[#allocation55_spill]]  ;;  %s4680_s22 = sld [smem:[#allocation52_spill]] }
 0x199   : > { %2762 = vmatprep.subr.bf16.mxu0 %v3608_v0  ;;  %2773 = vmatpush3.bf16.msra.mxu1 %v3090_v4  ;;  %v3093_v11 = vld [vmem:[%s4672_s18 + $0x18] sm:$0xff]   ;;  %v3094_v13 = vld [vmem:[%s4672_s18 + $0x20] sm:$0xff]   ;;  %v3095_v14 = vld [vmem:[%s4672_s18 + $0x28] sm:$0xff]   ;;  %s4681_s0 = sld [smem:[#allocation54_spill]]  ;;  %s2682_s29 = sshll.u32 %s3764_s26, 7 }
 0x19a   : > { %2774 = vmatprep.subr.bf16.mxu1 %v3608_v0  ;;  %s1012_s25 = scalar_lea.vmem %s4673_s8, %s4183_s5  ;;  %v3096_v15 = vld [vmem:[%s4672_s18 + $0x30] sm:$0xff]   ;;  %v3097_v16 = vld [vmem:[%s4672_s18 + $0x38] sm:$0xff]   ;;  %s3610_s8 = smov 32  }
 0x19b   : > { %v4202_v10 = vld [vmem:[%s1012_s25] sm:$0xff]  ;;  %s4674_s25 = sld [smem:[#allocation46_spill]]  ;;  %1350 = vrot.lane.b32.xlu0 %v4271_v36, %s3610_s8  ;;  %v2610_v4 = vld [vmem:[#allocation16] ss:$0 sm:$0xff]  ;;  %v2620_v24 = vld [vmem:[#allocation19] ss:$0 sm:$0xff] }
 0x19c   : > { %2763 = vmatpush3.bf16.msra.mxu0 %v3087_v3  ;;  %v1034_v12 = vpack.c.bf16 %v4202_v10, %v4202_v10  ;;  %v3112_v2 = vld [vmem:[%s4675_s15] sm:$0xff]   ;;  %v3113_v3 = vld [vmem:[%s4675_s15 + $0x8] sm:$0xff]   ;;  %s4684_s27 = sld [smem:[#allocation57_spill]] }
 0x19d   : > { %2764 = vmatprep.subr.bf16.mxu0 %v3608_v0  ;;  %2775 = vmatpush3.bf16.msra.mxu1 %v3091_v6  ;;  %s1016_s21 = scalar_lea.vmem %s4677_s23, %s4183_s5 }
 0x19e   : > { %2776 = vmatprep.subr.bf16.mxu1 %v3608_v0 }
 0x1a0   : > { %2765 = vmatpush3.bf16.msra.mxu0 %v3088_v7 }
 0x1a1   : > { %2766 = vmatprep.subr.bf16.mxu0 %v3608_v0  ;;  %2777 = vmatpush3.bf16.msra.mxu1 %v3092_v9  ;;  %v3098_v17 = vld [vmem:[%s4674_s25] sm:$0xff]   ;;  %v3099_v18 = vld [vmem:[%s4674_s25 + $0x8] sm:$0xff]   ;;  %v3100_v19 = vld [vmem:[%s4674_s25 + $0x10] sm:$0xff]  }
 0x1a2   : > { %2778 = vmatprep.subr.bf16.mxu1 %v3608_v0  ;;  %v3101_v20 = vld [vmem:[%s4674_s25 + $0x18] sm:$0xff]   ;;  %v3102_v21 = vld [vmem:[%s4674_s25 + $0x20] sm:$0xff]   ;;  %v3103_v22 = vld [vmem:[%s4674_s25 + $0x28] sm:$0xff]   ;;  %s4494_s30 = scalar_lea.hbm %s4684_s27, %s2682_s29 }
 0x1a3   : > { %v3104_v34 = vld [vmem:[%s4674_s25 + $0x30] sm:$0xff]   ;;  %v3105_v35 = vld [vmem:[%s4674_s25 + $0x38] sm:$0xff]  }
 0x1a4   : > { %2767 = vmatpush3.bf16.msra.mxu0 %v1074_v8 }
 0x1a5   : > { %2779 = vmatpush3.bf16.msra.mxu1 %v3093_v11  ;;  %2792 = vmatprep.subr.bf16.mxu0 %v3608_v0 }
 0x1a6   : > { %2780 = vmatprep.subr.bf16.mxu1 %v3608_v0 }
 0x1a7   : > { %2769 = vmatmul.mubr.msk.bf16.vlgmr.msra.gmra.mrb[0].mxu0 %vm1068_vm2, %v1034_v12 }
 0x1a8   : > { %2808 = vmatprep.mubr.msk.bf16.mxu0 %vm3609_vm0, %v3608_v0  ;;  %2793 = vmatpush3.bf16.msra.mxu0 %v3098_v17 }
 0x1a9   : > { %2781 = vmatpush3.bf16.msra.mxu1 %v3094_v13  ;;  %2794 = vmatprep.subr.bf16.mxu0 %v3608_v0  ;;  %v3114_v13 = vld [vmem:[%s4675_s15 + $0x10] sm:$0xff]  }
 0x1aa   : > { %2782 = vmatprep.subr.bf16.mxu1 %v3608_v0 }
 0x1ac   : > { %2795 = vmatpush3.bf16.msra.mxu0 %v3099_v18 }
 0x1ad   : > { %2783 = vmatpush3.bf16.msra.mxu1 %v3095_v14  ;;  %2796 = vmatprep.subr.bf16.mxu0 %v3608_v0  ;;  %v3115_v14 = vld [vmem:[%s4675_s15 + $0x18] sm:$0xff]  }
 0x1ae   : > { %2784 = vmatprep.subr.bf16.mxu1 %v3608_v0 }
 0x1b0   : > { %2797 = vmatpush3.bf16.msra.mxu0 %v3100_v19 }
 0x1b1   : > { %2785 = vmatpush3.bf16.msra.mxu1 %v3096_v15  ;;  %2798 = vmatprep.subr.bf16.mxu0 %v3608_v0  ;;  %v2614_v15 = vld [vmem:[#allocation17] ss:$0 sm:$0xff] }
 0x1b2   : > { %2786 = vmatprep.subr.bf16.mxu1 %v3608_v0 }
 0x1b4   : > { %2799 = vmatpush3.bf16.msra.mxu0 %v3101_v20 }
 0x1b5   : > { %2787 = vmatpush3.bf16.msra.mxu1 %v3097_v16  ;;  %2800 = vmatprep.subr.bf16.mxu0 %v3608_v0 }
 0x1b6   : > { %2812 = vmatprep.subr.bf16.mxu1 %v3608_v0 }
 0x1b8   : > { %2801 = vmatpush3.bf16.msra.mxu0 %v3102_v21 }
 0x1b9   : > { %2802 = vmatprep.subr.bf16.mxu0 %v3608_v0 }
 0x1bc   : > { %2803 = vmatpush3.bf16.msra.mxu0 %v3103_v22 }
 0x1bd   : > { %2804 = vmatprep.subr.bf16.mxu0 %v3608_v0 }
 0x1c0   : > { %2805 = vmatpush3.bf16.msra.mxu0 %v3104_v34 }
 0x1c1   : > { %2806 = vmatprep.subr.bf16.mxu0 %v3608_v0 }
 0x1c4   : > { %2807 = vmatpush3.bf16.msra.mxu0 %v3105_v35 }
 0x1c5   : > { %2832 = vmatprep.subr.bf16.mxu0 %v3608_v0 }
 0x20d   : > { %v1351_v55 = vpop.permute.xlu0 %1350 }
 0x27a   : > { %v1110_v25 = vpop.f32.mrb[0].mxu0 }
 0x27b   : > { %v1111_v26 = vadd.f32 %v2585_v23, %v1110_v25  ;;  %v2770_v28 = vpop.f32.mrb[1].mxu0  ;;  %v3116_v23 = vld [vmem:[#allocation14 + $0x10] sm:$0xff]   ;;  %v3117_v25 = vld [vmem:[#allocation14 + $0x18] sm:$0xff]  }
 0x27c   : > { %v1113_v29 = vpop.f32.mrb[2].mxu0 }
 0x27d   : > { %v1116_v30 = vmax.f32 %v1111_v26, 0.0  ;;  %v2771_v31 = vpop.f32.mrb[3].mxu0 }
 0x27f   : > { %v1119_v32 = vmul.f32 %v1118_v27, %v1116_v30 }
 0x281   : > { %v1137_v33 = vpack.c.bf16 %v1119_v32, %v1119_v32 }
 0x283   : > { %2789 = vmatmul.mubr.bf16.vlgmr.msra.gmra.mrb[0].mxu1 %v1137_v33 }
 0x284   : > { %2816 = vmatprep.mubr.msk.bf16.mxu1 %vm3609_vm0, %v3608_v0  ;;  %2813 = vmatpush3.bf16.msra.mxu1 %v3106_v45 }
 0x285   : > { %2814 = vmatprep.subr.bf16.mxu1 %v3608_v0 }
 0x288   : > { %2815 = vmatpush3.bf16.msra.mxu1 %v3107_v54  ;;  %v3120_v54 = vld [vmem:[%s4549_s13 + $0x30] sm:$0xff]  }
 0x289   : > { %2820 = vmatprep.subr.bf16.mxu1 %v3608_v0 }
 0x356   : > { %v1226_v38 = vpop.f32.mrb[0].mxu1 }
 0x357   : > { %v1227_v39 = vadd.f32 %v2592_v37, %v1226_v38  ;;  %v2790_v40 = vpop.f32.mrb[1].mxu1 }
 0x358   : > { %v1229_v41 = vpop.f32.mrb[2].mxu1 }
 0x359   : > { %v1232_v42 = vmax.f32 %v1227_v39, 0.0  ;;  %v2791_v43 = vpop.f32.mrb[3].mxu1 }
 0x35b   : > { %v1250_v44 = vpack.c.bf16 %v1232_v42, %v1232_v42 }
 0x35d   : > { %2809 = vmatmul.mubr.bf16.vlgmr.msra.gmra.mrb[4].mxu0 %v1250_v44 }
 0x35e   : > { %2840 = vmatprep.mubr.msk.bf16.mxu0 %vm3609_vm0, %v3608_v0  ;;  %2833 = vmatpush3.bf16.msra.mxu0 %v3112_v2 }
 0x35f   : > { %2834 = vmatprep.subr.bf16.mxu0 %v3608_v0 }
 0x362   : > { %2835 = vmatpush3.bf16.msra.mxu0 %v3113_v3  ;;  %v3124_v3 = vld [vmem:[%s4675_s15 + $0x30] sm:$0xff]  }
 0x363   : > { %2836 = vmatprep.subr.bf16.mxu0 %v3608_v0 }
 0x366   : > { %2837 = vmatpush3.bf16.msra.mxu0 %v3114_v13 }
 0x367   : > { %2838 = vmatprep.subr.bf16.mxu0 %v3608_v0 }
 0x36a   : > { %2839 = vmatpush3.bf16.msra.mxu0 %v3115_v14  ;;  %v2652_v14 = vld [vmem:[#allocation19 + $0x1] ss:$0 sm:$0xff] }
 0x36b   : > { %2864 = vmatprep.subr.bf16.mxu0 %v3608_v0 }
 0x430   : > { %v1339_v47 = vpop.f32.mrb[4].mxu0 }
 0x431   : > { %v4278_v48 = vadd.f32 %v2601_v46, %v1339_v47  ;;  %v2810_v49 = vpop.f32.mrb[5].mxu0 }
 0x432   : > { %v1342_v50 = vpop.f32.mrb[6].mxu0 }
 0x433   : > { %v1346_v51 = vmul.f32 0.5, %v4278_v48  ;;  %v2811_v52 = vpop.f32.mrb[7].mxu0 }
 0x435   : > { %v1347_v53 = vmul.f32 1.442695, %v1346_v51  ;;  %v3118_v51 = vld [vmem:[%s4549_s13 + $0x20] sm:$0xff]  }
 0x437   : > { %3144 = vpow2.f32 %v1347_v53  ;;  %v3119_v53 = vld [vmem:[%s4549_s13 + $0x28] sm:$0xff]  }
 0x441   : > { %v3145_v56 = vpop.eup %3144 }
 0x442   : > { %v1353_v57 = vmul.f32 %v3145_v56, %v1351_v55  ;;  %v3121_v55 = vld [vmem:[%s4549_s13 + $0x38] sm:$0xff]   ;;  %v3122_v56 = vld [vmem:[%s4675_s15 + $0x20] sm:$0xff]  }
 0x444   : > { %1355 = vrot.lane.b32.xlu0 %v1353_v57, %s3611_s4  ;;  %v3123_v57 = vld [vmem:[%s4675_s15 + $0x28] sm:$0xff]  }
 0x4b6   : > { %v1356_v58 = vpop.permute.xlu0 %1355 }
 0x4b7   : > { %v1358_v59 = vadd.f32 %v1356_v58, %v4278_v48  ;;  %v2626_v58 = vld [vmem:[#allocation16 + $0x1] ss:$0 sm:$0xff] }
 0x4b9   : > { %v1364_v61 = vpack.c.bf16 %v1358_v59, %v1358_v59  ;;  %1608 = vrot.lane.b32.xlu1 %v1358_v59, %s3610_s8 }
 0x4bb   : > { %2817 = vmatmul.mubr.msk.bf16.vlgmr.msra.gmra.mrb[4].mxu1 %vm1383_vm3, %v1364_v61 }
 0x4bc   : > { %2821 = vmatpush3.bf16.msra.mxu1 %v3108_v60  ;;  %2828 = vmatprep.mubr.msk.bf16.mxu1 %vm3609_vm0, %v3608_v0 }
 0x4bd   : > { %2822 = vmatprep.subr.bf16.mxu1 %v3608_v0 }
 0x4c0   : > { %2823 = vmatpush3.bf16.msra.mxu1 %v3109_v62 }
 0x4c1   : > { %2824 = vmatprep.subr.bf16.mxu1 %v3608_v0 }
 0x4c4   : > { %2825 = vmatpush3.bf16.msra.mxu1 %v3110_v63 }
 0x4c5   : > { %2826 = vmatprep.subr.bf16.mxu1 %v3608_v0 }
 0x4c8   : > { %2827 = vmatpush3.bf16.msra.mxu1 %v3111_v1 }
 0x4c9   : > { %2844 = vmatprep.subr.bf16.mxu1 %v3608_v0 }
 0x52b   : > { %v1609_v43 = vpop.permute.xlu1 %1608 }
 0x58e   : > { %v1421_v5 = vpop.f32.mrb[4].mxu1 }
 0x58f   : > { %v1422_v6 = vadd.f32 %v2610_v4, %v1421_v5  ;;  %v2818_v7 = vpop.f32.mrb[5].mxu1  ;;  %v3125_v4 = vld [vmem:[%s4675_s15 + $0x38] sm:$0xff]  }
 0x590   : > { %v1424_v8 = vpop.f32.mrb[6].mxu1  ;;  %v2638_v5 = vld [vmem:[#allocation17 + $0x1] ss:$0 sm:$0xff] }
 0x591   : > { %v1427_v9 = vmax.f32 %v1422_v6, 0.0  ;;  %v2819_v11 = vpop.f32.mrb[7].mxu1 }
 0x593   : > { %v1437_v12 = vpack.c.bf16 %v1427_v9, %v1427_v9 }
 0x595   : > { %2829 = vmatmul.mubr.msk.bf16.vlgmr.msra.gmra.mrb[8].mxu1 %vm1468_vm4, %v1437_v12 }
 0x596   : > { %2848 = vmatprep.mubr.msk.bf16.mxu1 %vm3609_vm0, %v3608_v0  ;;  %2845 = vmatpush3.bf16.msra.mxu1 %v3116_v23 }
 0x597   : > { %2846 = vmatprep.subr.bf16.mxu1 %v3608_v0 }
 0x59a   : > { %2847 = vmatpush3.bf16.msra.mxu1 %v3117_v25  ;;  %v3127_v25 = vld [vmem:[#allocation20 + $0x8] sm:$0xff]  }
 0x59b   : > { %2852 = vmatprep.subr.bf16.mxu1 %v3608_v0 }
 0x668   : > { %v1506_v16 = vpop.f32.mrb[8].mxu1 }
 0x669   : > { %v1507_v17 = vadd.f32 %v2614_v15, %v1506_v16  ;;  %v2830_v18 = vpop.f32.mrb[9].mxu1 }
 0x66a   : > { %v1509_v19 = vpop.f32.mrb[10].mxu1 }
 0x66b   : > { %v1512_v20 = vmax.f32 %v1507_v17, 0.0  ;;  %v2831_v21 = vpop.f32.mrb[11].mxu1  ;;  %v2254_v19 = vmul.f32 %v4271_v36, %v4271_v36 }
 0x66c   : > { %v1903_v21 = vld [vmem:[%s4676_s14] sm:$0xf]  ;;  %s3612_s14 = smov [#allocation22]  }
 0x66d   : > { %v1522_v22 = vpack.c.bf16 %v1512_v20, %v1512_v20  ;;  %v1910_v23 = vsel %vm1072_vm1, %v1903_v21, 0 }
 0x66f   : > { %2841 = vmatmul.mubr.msk.bf16.vlgmr.msra.gmra.mrb[8].mxu0 %vm1468_vm4, %v1522_v22  ;;  %v3126_v22 = vld [vmem:[#allocation20] sm:$0xff]  }
 0x670   : > { %2872 = vmatprep.mubr.msk.bf16.mxu0 %vm3609_vm0, %v3608_v0  ;;  %2865 = vmatpush3.bf16.msra.mxu0 %v3122_v56 }
 0x671   : > { %2866 = vmatprep.subr.bf16.mxu0 %v3608_v0 }
 0x674   : > { %2867 = vmatpush3.bf16.msra.mxu0 %v3123_v57 }
 0x675   : > { %2868 = vmatprep.subr.bf16.mxu0 %v3608_v0 }
 0x678   : > { %2869 = vmatpush3.bf16.msra.mxu0 %v3124_v3  ;;  %v3135_v3 = vld [vmem:[%s4678_s3 + $0x38] sm:$0xff]  }
 0x679   : > { %2870 = vmatprep.subr.bf16.mxu0 %v3608_v0 }
 0x67c   : > { %2871 = vmatpush3.bf16.msra.mxu0 %v3125_v4  ;;  %v3136_v4 = vld [vmem:[%s4679_s10] sm:$0xff]  }
 0x67d   : > { %2882 = vmatprep.subr.bf16.mxu0 %v3608_v0 }
 0x742   : > { %v1590_v26 = vpop.f32.mrb[8].mxu0 }
 0x743   : > { %v1591_v27 = vadd.f32 %v2620_v24, %v1590_v26  ;;  %v2842_v28 = vpop.f32.mrb[9].mxu0  ;;  %v1023_v24 = vld [vmem:[%s1016_s21] sm:$0xff]  ;;  %s4682_s21 = sld [smem:[#allocation56_spill]] }
 0x744   : > { %v1593_v29 = vpop.f32.mrb[10].mxu0  ;;  %v1904_v26 = vpack.c.bf16 %v1023_v24, %v1023_v24  ;;  %v3143_v24 = vld [vmem:[%s4679_s10 + $0x38] sm:$0xff]  }
 0x745   : > { %1614 = vrot.lane.b32.xlu1 %v1591_v27, %s3610_s8  ;;  %v2843_v30 = vpop.f32.mrb[11].mxu0  ;;  %v1597_v31 = vand.u32 2147483647, %v1591_v27  ;;  %v1596_v39 = vmin.f32 %v1591_v27, 0.0 }
 0x747   : > { %v1598_v32 = vsub.f32 0.0, %v1597_v31 }
 0x749   : > { %v1599_v33 = vmul.f32 1.442695, %v1598_v32 }
 0x74b   : > { %3146 = vpow2.f32 %v1599_v33 }
 0x755   : > { %v3147_v34 = vpop.eup %3146 }
 0x756   : > { %v1601_v35 = vadd.f32 1.0, %v3147_v34 }
 0x758   : > { %3148 = vlog2.f32 %v1601_v35 }
 0x762   : > { %v3149_v37 = vpop.eup %3148 }
 0x763   : > { %v1603_v38 = vmul.f32 0.6931472, %v3149_v37 }
 0x765   : > { %v4329_v40 = vsub.f32 %v1596_v39, %v1603_v38 }
 0x767   : > { %v1605_v41 = vmul.f32 1.442695, %v4329_v40 }
 0x769   : > { %3150 = vpow2.f32 %v1605_v41 }
 0x773   : > { %v3151_v42 = vpop.eup %3150 }
 0x774   : > { %v1612_v44 = vsub.f32 1.0, %v3151_v42  ;;  %v1611_v46 = vmul.f32 %v3151_v42, %v1609_v43 }
 0x7b7   : > { %v1615_v45 = vpop.permute.xlu1 %1614 }
 0x7b8   : > { %v1617_v47 = vmul.f32 %v1615_v45, %v1612_v44 }
 0x7ba   : > { %v4332_v49 = vadd.f32 %v1617_v47, %v1611_v46 }
 0x7bc   : > { %v1634_v50 = vpack.c.bf16 %v4332_v49, %v4332_v49 }
 0x7be   : > { %1642 = vrot.lane.b32.xlu0 %v1634_v50, %s3611_s4 }
 0x830   : > { %v1643_v52 = vpop.permute.xlu0 %1642 }
 0x831   : > { %2849 = vmatmul.mubr.msk.bf16.vlgmr.msra.gmra.mrb[12].mxu1 %vm1383_vm3, %v1643_v52 }
 0x832   : > { %2853 = vmatpush3.bf16.msra.mxu1 %v3118_v51  ;;  %2860 = vmatprep.mubr.msk.bf16.mxu1 %vm3609_vm0, %v3608_v0 }
 0x833   : > { %2854 = vmatprep.subr.bf16.mxu1 %v3608_v0 }
 0x836   : > { %2855 = vmatpush3.bf16.msra.mxu1 %v3119_v53 }
 0x837   : > { %2856 = vmatprep.subr.bf16.mxu1 %v3608_v0 }
 0x83a   : > { %2857 = vmatpush3.bf16.msra.mxu1 %v3120_v54 }
 0x83b   : > { %2858 = vmatprep.subr.bf16.mxu1 %v3608_v0 }
 0x83e   : > { %2859 = vmatpush3.bf16.msra.mxu1 %v3121_v55 }
 0x83f   : > { %2876 = vmatprep.subr.bf16.mxu1 %v3608_v0 }
 0x904   : > { %v1693_v59 = vpop.f32.mrb[12].mxu1 }
 0x905   : > { %v1694_v60 = vadd.f32 %v2626_v58, %v1693_v59  ;;  %v2850_v61 = vpop.f32.mrb[13].mxu1  ;;  %v3129_v58 = vld [vmem:[%s4678_s3 + $0x8] sm:$0xff]  }
 0x906   : > { %v1696_v62 = vpop.f32.mrb[14].mxu1  ;;  %v3130_v61 = vld [vmem:[%s4678_s3 + $0x10] sm:$0xff]  }
 0x907   : > { %v1699_v63 = vmax.f32 %v1694_v60, 0.0  ;;  %v2851_v1 = vpop.f32.mrb[15].mxu1  ;;  %v3131_v62 = vld [vmem:[%s4678_s3 + $0x18] sm:$0xff]  }
 0x908   : > { %v3133_v1 = vld [vmem:[%s4678_s3 + $0x28] sm:$0xff]  }
 0x909   : > { %v1711_v2 = vpack.c.bf16 %v1699_v63, %v1699_v63  ;;  %v3132_v63 = vld [vmem:[%s4678_s3 + $0x20] sm:$0xff]  }
 0x90b   : > { %2861 = vmatmul.mubr.msk.bf16.vlgmr.msra.gmra.mrb[16].mxu1 %vm1468_vm4, %v1711_v2  ;;  %v3134_v2 = vld [vmem:[%s4678_s3 + $0x30] sm:$0xff]  }
 0x90c   : > { %2878 = vmatprep.mubr.msk.bf16.mxu1 %vm3609_vm0, %v3608_v0  ;;  %2877 = vmatpush3.bf16.msra.mxu1 %v1910_v23  ;;  %v3142_v23 = vld [vmem:[%s4679_s10 + $0x30] sm:$0xff]  }
 0x90d   : > { %2890 = vmatprep.subr.bf16.mxu1 %v3608_v0 }
 0x913   : > { %2879 = vmatmul.mubr.msk.bf16.vlgmr.msra.gmra.mrb[20].mxu1 %vm1905_vm5, %v1904_v26 }
 0x914   : > { %2906 = vmatprep.mubr.msk.bf16.mxu1 %vm3609_vm0, %v3608_v0 }
 0x9de   : > { %v1779_v6 = vpop.f32.mrb[16].mxu1 }
 0x9df   : > { %v1780_v7 = vadd.f32 %v2638_v5, %v1779_v6  ;;  %v2862_v8 = vpop.f32.mrb[17].mxu1  ;;  %v3137_v5 = vld [vmem:[%s4679_s10 + $0x8] sm:$0xff]   ;;  %v3138_v6 = vld [vmem:[%s4679_s10 + $0x10] sm:$0xff]  }
 0x9e0   : > { %v1782_v9 = vpop.f32.mrb[18].mxu1  ;;  %v3140_v8 = vld [vmem:[%s4679_s10 + $0x20] sm:$0xff]  }
 0x9e1   : > { %v1785_v11 = vmax.f32 %v1780_v7, 0.0  ;;  %v2863_v12 = vpop.f32.mrb[19].mxu1  ;;  %v3139_v7 = vld [vmem:[%s4679_s10 + $0x18] sm:$0xff]   ;;  %v3141_v9 = vld [vmem:[%s4679_s10 + $0x28] sm:$0xff]  }
 0x9e2   : > { %v2662_v12 = vld [vmem:[%s4680_s22] ss:$0 sm:$0xff] }
 0x9e3   : > { %v1797_v13 = vpack.c.bf16 %v1785_v11, %v1785_v11 }
 0x9e5   : > { %2873 = vmatmul.mubr.msk.bf16.vlgmr.msra.gmra.mrb[12].mxu0 %vm1468_vm4, %v1797_v13  ;;  %v2019_v13 = vld [vmem:[%s884_s20] sm:$0xff]  ;;  %s2283_s20 = scalar_lea.sflag [#allocation4], %s4136_s24 }
 0x9e6   : > { %2886 = vmatprep.mubr.msk.bf16.mxu0 %vm3609_vm0, %v3608_v0  ;;  %2883 = vmatpush3.bf16.msra.mxu0 %v3126_v22  ;;  %v1946_v56 = vpop.f32.mrb[20].mxu1 }
 0x9e7   : > { %2884 = vmatprep.subr.bf16.mxu0 %v3608_v0  ;;  %v2880_v57 = vpop.f32.mrb[21].mxu1 }
 0x9e8   : > { %v1949_v59 = vpop.f32.mrb[22].mxu1 }
 0x9e9   : > { %v2881_v60 = vpop.f32.mrb[23].mxu1 }
 0x9ea   : > { %2885 = vmatpush3.bf16.msra.mxu0 %v3127_v25  ;;  %v2663_v25 = vld [vmem:[%s4681_s0] ss:$0 sm:$0xff]  ;;  %s3504_s0 = sshll.u32 %s3612_s14, 4  ;;  %s3505_s0 = int_to_ptr.vmem [resolvable:$false] %s3504_s0 }
 0x9eb   : > { %2910 = vmatprep.subr.bf16.mxu0 %v3608_v0  ;;  %s3506_s9 = scalar_lea.vmem %s3505_s0, 256 }
 0xab8   : > { %v1865_v15 = vpop.f32.mrb[12].mxu0 }
 0xab9   : > { %v1866_v16 = vadd.f32 %v2652_v14, %v1865_v15  ;;  %v2874_v17 = vpop.f32.mrb[13].mxu0 }
 0xaba   : > { %v1868_v18 = vpop.f32.mrb[14].mxu0 }
 0xabb   : > { %1885 = vrot.lane.b32.xlu1 %v1866_v16, %s3610_s8  ;;  %v2875_v20 = vpop.f32.mrb[15].mxu0  ;;  %v1872_v36 = vand.u32 2147483647, %v1866_v16  ;;  %v1871_v33 = vmin.f32 %v1866_v16, 0.0  ;;  %v2020_v18 = vmul.f32 2.0, %v2019_v13 }
 0xabd   : > { %v1873_v27 = vsub.f32 0.0, %v1872_v36 }
 0xabf   : > { %2256 = vrot.lane.b32.xlu1 %v2254_v19, %s3610_s8  ;;  %v1874_v28 = vmul.f32 1.442695, %v1873_v27  ;;  %s4683_s8 = sld [smem:[#allocation35_spill]] }
 0xac1   : > { %3152 = vpow2.f32 %v1874_v28 }
 0xac5   : > { %p4685_p2 = scmp.ne.s32.totalorder %s4683_s8, 0 }
 0xacb   : > { %v3153_v29 = vpop.eup %3152 }
 0xacc   : > { %v1876_v30 = vadd.f32 1.0, %v3153_v29 }
 0xace   : > { %3154 = vlog2.f32 %v1876_v30 }
 0xad8   : > { %v3155_v31 = vpop.eup %3154 }
 0xad9   : > { %v1878_v32 = vmul.f32 0.6931472, %v3155_v31 }
 0xadb   : > { %v1879_v34 = vsub.f32 %v1871_v33, %v1878_v32 }
 0xadd   : > { %v1880_v35 = vmul.f32 1.442695, %v1879_v34 }
 0xadf   : > { %3156 = vpow2.f32 %v1880_v35 }
 0xae9   : > { %v3157_v37 = vpop.eup %3156 }
 0xaea   : > { %v1883_v38 = vsub.f32 1.0, %v3157_v37  ;;  %v1882_v41 = vmul.f32 %v3157_v37, %v4332_v49 }
 0xb2d   : > { %v1886_v39 = vpop.permute.xlu1 %1885 }
 0xb2e   : > { %v1888_v42 = vmul.f32 %v1886_v39, %v1883_v38 }
 0xb30   : > { %v1889_v43 = vadd.f32 %v1888_v42, %v1882_v41 }
 0xb31   : > { %v2257_v46 = vpop.permute.xlu1 %2256 }
 0xb32   : > { %v2268_v44 = vmul.f32 %v1889_v43, %v1889_v43  ;;  %v1902_v45 = vpack.c.bf16 %v1889_v43, %v1889_v43  ;;  %v2259_v47 = vadd.f32 %v2257_v46, %v4278_v48 }
 0xb34   : > { %2270 = vrot.lane.b32.xlu1 %v2268_v44, %s3611_s4  ;;  %1953 = vrot.lane.b32.xlu0 %v1902_v45, %s3611_s4 }
 0xb38   : > { %1891 = vrot.lane.b32.xlu1 %v1879_v34, %s3611_s4  ;;  %2261 = vrot.lane.b32.xlu0 %v2259_v47, %s3611_s4 }
 0xb3c   : > { %1620 = vrot.lane.b32.xlu0 %v4329_v40, %s3611_s4  ;;  %v3128_v40 = vld [vmem:[%s4678_s3] sm:$0xff]   ;;  %s1002_s4 = scalar_lea.vmem [#allocation22], %s4139_s28 }
 0xb3d   : > { %2891 = vmatpush3.bf16.msra.mxu1 %v3128_v40  ;;  %s2300_s22 = sshll.u32 %s1002_s4, 4  ;;  %s2301_s22 = int_to_ptr.vmem [resolvable:$true] %s2300_s22 }
 0xb3e   : > { %2892 = vmatprep.subr.bf16.mxu1 %v3608_v0  ;;  %s3500_s28 = scalar_lea.vmem %s2301_s22, 128  ;;  %p3507_p3 = scmp.lt.s32.totalorder %s2301_s22, %s3505_s0 }
 0xb3f   : > { %p3501_p10 = scmp.ne.s32.totalorder %s2301_s22, %s3500_s28  ;;  %p3508_p0 = scmp.lt.s32.totalorder %s3506_s9, %s3500_s28 }
 0xb41   : > { %2893 = vmatpush3.bf16.msra.mxu1 %v3129_v58  ;;  %p3502_p11 = pnand %p3501_p10, %p4685_p2  ;;  %p3509_p5 = por %p3508_p0, %p3507_p3 }
 0xb42   : > { %2894 = vmatprep.subr.bf16.mxu1 %v3608_v0 }
 0xb43   : > { %p3503_p8 = pneg %p3502_p11 }
 0xb45   : > { %2895 = vmatpush3.bf16.msra.mxu1 %v3130_v61  ;;  %p3510_p9 = pnand %p3509_p5, %p3503_p8 }
 0xb46   : > { %2896 = vmatprep.subr.bf16.mxu1 %v3608_v0 }
 0xb49   : > { %2897 = vmatpush3.bf16.msra.mxu1 %v3131_v62 }
 0xb4a   : > { %2898 = vmatprep.subr.bf16.mxu1 %v3608_v0 }
 0xb4d   : > { %2899 = vmatpush3.bf16.msra.mxu1 %v3132_v63 }
 0xb4e   : > { %2900 = vmatprep.subr.bf16.mxu1 %v3608_v0 }
 0xb51   : > { %2901 = vmatpush3.bf16.msra.mxu1 %v3133_v1 }
 0xb52   : > { %2902 = vmatprep.subr.bf16.mxu1 %v3608_v0 }
 0xb55   : > { %2903 = vmatpush3.bf16.msra.mxu1 %v3134_v2 }
 0xb56   : > { %2904 = vmatprep.subr.bf16.mxu1 %v3608_v0 }
 0xb59   : > { %2905 = vmatpush3.bf16.msra.mxu1 %v3135_v3 }
 0xba6   : > { %v2271_v50 = vpop.permute.xlu1 %2270  ;;  %v1954_v49 = vpop.permute.xlu0 %1953 }
 0xba7   : > { %2887 = vmatmul.mubr.msk.bf16.vlgmr.msra.gmra.mrb[16].mxu0 %vm1383_vm3, %v1954_v49  ;;  %v2273_v54 = vsel %vm1383_vm3, %v2271_v50, 0.0 }
 0xba8   : > { %2926 = vmatprep.mubr.msk.bf16.mxu0 %vm3609_vm0, %v3608_v0  ;;  %2911 = vmatpush3.bf16.msra.mxu0 %v3136_v4 }
 0xba9   : > { %2912 = vmatprep.subr.bf16.mxu0 %v3608_v0 }
 0xbaa   : > { %v1892_v51 = vpop.permute.xlu1 %1891  ;;  %v4406_v52 = vpop.permute.xlu0 %2261 }
 0xbab   : > { %v1894_v53 = vsel %vm1383_vm3, %v1892_v51, 0.0  ;;  %v2264_v42 = vsel %vm1383_vm3, %v4406_v52, 0.0 }
 0xbac   : > { %1895 = vadd.xlane.f32.xlu1 %v1894_v53  ;;  %2913 = vmatpush3.bf16.msra.mxu0 %v3137_v5 }
 0xbad   : > { %2914 = vmatprep.subr.bf16.mxu0 %v3608_v0 }
 0xbae   : > { %v1621_v48 = vpop.permute.xlu0 %1620 }
 0xbaf   : > { %v1623_v55 = vsel %vm1383_vm3, %v1621_v48, 0.0 }
 0xbb0   : > { %2274 = vadd.xlane.f32.xlu1 %v2273_v54  ;;  %1624 = vadd.xlane.f32.xlu0 %v1623_v55 }
 0xbb1   : > { %2915 = vmatpush3.bf16.msra.mxu0 %v3138_v6 }
 0xbb2   : > { %2916 = vmatprep.subr.bf16.mxu0 %v3608_v0 }
 0xbb5   : > { %2917 = vmatpush3.bf16.msra.mxu0 %v3139_v7 }
 0xbb6   : > { %2918 = vmatprep.subr.bf16.mxu0 %v3608_v0 }
 0xbb9   : > { %2919 = vmatpush3.bf16.msra.mxu0 %v3140_v8 }
 0xbba   : > { %2920 = vmatprep.subr.bf16.mxu0 %v3608_v0 }
 0xbbd   : > { %2921 = vmatpush3.bf16.msra.mxu0 %v3141_v9 }
 0xbbe   : > { %2922 = vmatprep.subr.bf16.mxu0 %v3608_v0 }
 0xbc1   : > { %2923 = vmatpush3.bf16.msra.mxu0 %v3142_v23 }
 0xbc2   : > { %2924 = vmatprep.subr.bf16.mxu0 %v3608_v0  ;;  %v2672_v0 = vld [vmem:[%s4682_s21] ss:$0 sm:$0xff] }
 0xbc5   : > { %2925 = vmatpush3.bf16.msra.mxu0 %v3143_v24 }
 0xc7a   : > { %v2004_v11 = vpop.f32.mrb[16].mxu0 }
 0xc7b   : > { %v2005_v14 = vadd.f32 %v2004_v11, %v1946_v56  ;;  %v2888_v15 = vpop.f32.mrb[17].mxu0 }
 0xc7c   : > { %v2007_v16 = vpop.f32.mrb[18].mxu0 }
 0xc7d   : > { %v2017_v17 = vadd.f32 %v2662_v12, %v2005_v14  ;;  %v2889_v19 = vpop.f32.mrb[19].mxu0 }
 0xc7f   : > { %v2018_v20 = vmax.f32 %v2017_v17, 0.0 }
 0xc81   : > { %v2021_v21 = vmul.f32 %v2020_v18, %v2018_v20 }
 0xc83   : > { %v2039_v22 = vpack.c.bf16 %v2021_v21, %v2021_v21 }
 0xc85   : > { %2907 = vmatmul.mubr.bf16.vlgmr.msra.gmra.mrb[24].mxu1 %v2039_v22 }
 0xd58   : > { %v2128_v26 = vpop.f32.mrb[24].mxu1 }
 0xd59   : > { %v2129_v36 = vadd.f32 %v2663_v25, %v2128_v26  ;;  %v2908_v27 = vpop.f32.mrb[25].mxu1 }
 0xd5a   : > { %v2131_v28 = vpop.f32.mrb[26].mxu1 }
 0xd5b   : > { %v2134_v29 = vmax.f32 %v2129_v36, 0.0  ;;  %v2909_v30 = vpop.f32.mrb[27].mxu1 }
 0xd5d   : > { %v2152_v31 = vpack.c.bf16 %v2134_v29, %v2134_v29 }
 0xd5f   : > { %2927 = vmatmul.mubr.bf16.vlgmr.msra.gmra.mrb[20].mxu0 %v2152_v31 }
 0xe32   : > { %v2241_v32 = vpop.f32.mrb[20].mxu0 }
 0xe33   : > { %v2242_v33 = vadd.f32 %v2672_v0, %v2241_v32  ;;  %v2928_v34 = vpop.f32.mrb[21].mxu0 }
 0xe34   : > { %v2244_v35 = vpop.f32.mrb[22].mxu0 }
 0xe35   : > { %v2248_v37 = vsub.f32 %v2242_v33, %v4202_v10  ;;  %v2929_v38 = vpop.f32.mrb[23].mxu0  ;;  %2247 = vst.msk [vmem:[%s1002_s4] sm:$0xff] %vm1468_vm4, %v2242_v33 }
 0xe37   : > { %v2249_v39 = vmul.f32 %v2248_v37, %v2248_v37 }
 0xe39   : > { %v2250_v41 = vsel %vm1468_vm4, %v2249_v39, 0.0 }
 0xe3a   : > { %2251 = vadd.xlane.f32.xlu0 %v2250_v41 }
 0xe3e   : > { %2265 = vadd.xlane.f32.xlu0 %v2264_v42 }
 0xe3f   : > { %3513 = shalt.err (!%p3510_p9)
}
 0xe40   : > { %s3514_s26 = scalar_lea.hbm %s4494_s30, 128  ;;  %s3518_s21 = scalar_lea.hbm %s4684_s27, 256 }
 0xe41   : > { %p3515_p6 = scmp.ne.s32.totalorder %s4494_s30, %s3514_s26  ;;  %p3519_p13 = scmp.lt.u32.totalorder %s4494_s30, %s4684_s27 }
 0xe42   : > { %p3520_p12 = scmp.lt.u32.totalorder %s3518_s21, %s3514_s26  ;;  %p3522_p10 = scmp.lt.u32.totalorder %s3514_s26, %s4494_s30 }
 0xe43   : > { %p3516_p1 = pnand %p3515_p6, %p4685_p2 }
 0xe44   : > { %p3521_p4 = por %p3520_p12, %p3519_p13 }
 0xe45   : > { %p3517_p7 = pneg %p3516_p1 }
 0xe46   : > { %p3523_p11 = por %p3522_p10, %p3521_p4 }
 0xe48   : > { %p3524_p8 = pnand %p3523_p11, %p3517_p7 }
 0xe4a   : > { %3527 = shalt.err (!%p3524_p8)
}
 0xe4b   : > { %2972 = dma.vmem_to_hbm [thread:$0]  (%p4685_p2), %s2301_s22, 128, %s4494_s30, %s2283_s20   ;;  %v1896_v10 = vpop.xlane.xlu1 %1895  ;;  %v1625_v43 = vpop.xlane.xlu0 %1624  ;;  %vm2280_vm6 = vcmask 7168  }
 0xe4c   : > { %v1897_v49 = vadd.f32 %v1896_v10, %v1625_v43  ;;  %s4686_s28 = sld [smem:[#allocation58_spill]] }
 0xe4f   : > { %v2275_v45 = vpop.xlane.xlu1 %2274 }
 0xe50   : > { %v2276_v47 = vmul.f32 -0.5, %v2275_v45 }
 0xe52   : > { %s1020_s14 = scalar_lea.vmem %s4686_s28, %s4183_s5 }
 0xec7   : > { %v2252_v44 = vpop.xlane.xlu0 %2251 }
 0xec8   : > { %v2253_v52 = vmul.f32 0.5, %v2252_v44 }
 0xecb   : > { %v2266_v46 = vpop.xlane.xlu0 %2265 }
 0xecc   : > { %v2267_v50 = vmul.f32 -0.5, %v2266_v46 }
 0xece   : > { %v2277_v51 = vsub.f32 %v2267_v50, %v2276_v47 }
 0xed0   : > { %v2278_v53 = vsub.f32 %v2277_v51, %v1897_v49 }
 0xed2   : > { %v2279_v48 = vadd.f32 %v2278_v53, %v2253_v52 }
 0xed4   : > { %2281 = vst.msk [vmem:[%s1020_s14] sm:$0xff] %vm2280_vm6, %v2279_v48 }
 0xed5 PF: > { %s4687_s8 = sld [smem:[#allocation31_spill]]  ;;  %s4688_s22 = sld [smem:[#allocation36_spill]] }
 0xed6   : > { %s4689_s30 = sld [smem:[#allocation32_spill]] }
 0xedb   : > { %s2315_s20 = sand.u32 1, %s4687_s8   ;;  %p4690_p2 = scmp.ne.s32.totalorder %s4688_s22, 0 }
 0xedc   : > { %p4691_p3 = scmp.ge.s32.totalorder %s4689_s30, 2  ;;  %s2316_s0 = scalar_lea.sflag [#allocation4], %s2315_s20 }
 0xede   : > { %p3013_p0 = pnand %p4691_p3, %p4690_p2 }
 0xee0   : > { %3573 = dma.done.wait (!%p3013_p0), %s2316_s0, 128  }
 0xee1   : > { %3575 = vsyncadd (!%p3013_p0), %s2316_s0, 4294967168  ;;  %s4692_s30 = sld [smem:[#allocation33_spill]]  ;;  %s4693_s9 = sld [smem:[#allocation34_spill]] }
 0xee2   : > { %s4694_s29 = smov %s3582_s2  ;;  %s4695_s2 = smov %s3586_s6 }
 0xee7   : > { %p47_p5 = scmp.ge.s32.totalorder %s4692_s30, 4   ;;  %s4696_s6 = smov %s4693_s9 }
 0xee9   :  { %49 = sbr.rel (!%p47_p5) target bundleno = 35 (0x23), region = 245 }
 0xef0   :  { %2328 = vsyncpa [#allocation3], 1 }
 0xef1   :  { %2330 = vsyncpa [#allocation3 + $0x1], 1 }
 0xef2   :  { %2331 = vsyncpa [#allocation6], 1 }
 0xef3   :  { %2333 = vsyncpa [#allocation6 + $0x1], 1 }
 0xef4   :  { %2334 = vsyncpa [#allocation9], 1 }
 0xef5   :  { %2335 = vsyncpa [#allocation12], 1 }
 0xef6   :  { %2336 = vsyncpa [#allocation15], 1 }
 0xef7   :  { %2337 = vsyncpa [#allocation18], 1 }
 0xef8   :  { %2338 = vsyncpa [#allocation21], 1 }
 0xef9   :  { %2339 = vsyncpa [#allocation4], 1 }
 0xefa   :  { %2341 = vsyncpa [#allocation4 + $0x1], 1 }

</bundles_post_ra>
